<compile_context>
chip_gen: v7x
topology: tpu7x:2x2x1
jax: 0.10.0
libtpu: 0.0.40
codegen_flags: <defaults>
</compile_context>

<pallas_src>
import functools
import numpy as np

import jax
import jax.numpy as jnp
from jax.experimental import pallas as pl
from jax.experimental.pallas import tpu as pltpu

_EPS = 1e-7
_NEG_LARGE = -1e9          # finite logit padding (padded classes -> ~0 prob)
_COST_BIG = 1e9            # cost assigned to invalid / padded rows & columns
_LANE = 128


def _round_up(x, m):
    return ((x + m - 1) // m) * m


# ----------------------------------------------------------------------------
# Kernel 1: fused per-(image, layer) matching cost + greedy assignment
# ----------------------------------------------------------------------------
def _make_match_kernel(class_w, bbox_w, giou_w, q_valid, g_steps):
    def kernel(logits_ref, pbox_ref, gpack_ref, goh_ref, match_ref):
        Qp, _ = logits_ref.shape
        Gp = gpack_ref.shape[-1]

        # --- softmax over classes (padded class lanes hold -1e9 -> ~0 prob) ---
        logits = logits_ref[...]                                   # (Qp, Cpad)
        m = jnp.max(logits, axis=-1, keepdims=True)
        e = jnp.exp(logits - m)
        prob = e / jnp.sum(e, axis=-1, keepdims=True)

        # --- class cost: -prob[:, gt_label] via one-hot matmul (MXU, f32) ---
        cost = -class_w * jnp.dot(prob, goh_ref[...],
                                  preferred_element_type=jnp.float32)  # (Qp, Gp)

        # --- pairwise box costs (accumulated in place to limit live temps) ---
        pb = pbox_ref[...]                                         # (Qp, 4)
        pcx = pb[:, 0:1]
        pcy = pb[:, 1:2]
        pw = pb[:, 2:3]
        ph = pb[:, 3:4]
        g = gpack_ref[...]                                         # (8, Gp)
        gcx = g[0:1, :]
        gcy = g[1:2, :]
        gw = g[2:3, :]
        gh = g[3:4, :]
        gvalid = g[4:5, :]

        cost = cost + bbox_w * (jnp.abs(pcx - gcx) + jnp.abs(pcy - gcy)
                                + jnp.abs(pw - gw) + jnp.abs(ph - gh))

        px1 = pcx - 0.5 * pw
        py1 = pcy - 0.5 * ph
        px2 = pcx + 0.5 * pw
        py2 = pcy + 0.5 * ph
        gx1 = gcx - 0.5 * gw
        gy1 = gcy - 0.5 * gh
        gx2 = gcx + 0.5 * gw
        gy2 = gcy + 0.5 * gh
        iw = jnp.maximum(jnp.minimum(px2, gx2) - jnp.maximum(px1, gx1), 0.0)
        ih = jnp.maximum(jnp.minimum(py2, gy2) - jnp.maximum(py1, gy1), 0.0)
        inter = iw * ih
        union = (px2 - px1) * (py2 - py1) + (gx2 - gx1) * (gy2 - gy1) - inter
        iou = inter / (union + _EPS)
        earea = ((jnp.maximum(px2, gx2) - jnp.minimum(px1, gx1)) *
                 (jnp.maximum(py2, gy2) - jnp.minimum(py1, gy1)))
        giou = iou - (earea - union) / (earea + _EPS)
        cost = cost - giou_w * giou

        # --- in-kernel validity: invalid GT columns + padded query rows ---
        row_i = jax.lax.broadcasted_iota(jnp.int32, (Qp, Gp), 0)
        col_i = jax.lax.broadcasted_iota(jnp.int32, (Qp, Gp), 1)
        cost = cost + (1.0 - gvalid) * _COST_BIG
        cost = jnp.where(row_i >= q_valid, _COST_BIG, cost)

        # --- fused greedy assignment on the VMEM-resident cost block ---
        # TODO(synk): exact Hungarian assignment has no clean Pallas/JAX
        # equivalent; deterministic greedy matching (global argmin per step).
        row_f = row_i.astype(jnp.float32)
        col_f = col_i.astype(jnp.float32)
        flat_f = row_f * float(Gp) + col_f
        lane1 = jax.lax.broadcasted_iota(jnp.int32, (1, Gp), 1)

        def body(k, carry):
            c, pacc, gacc, vacc = carry
            mn = jnp.min(c, keepdims=True)                         # (1, 1)
            sel = jnp.min(jnp.where(c <= mn, flat_f, float(Qp * Gp)),
                          keepdims=True)                           # (1, 1)
            r_sel = jnp.floor(sel / float(Gp))
            c_sel = sel - r_sel * float(Gp)
            ok = mn < (0.5 * _COST_BIG)                            # (1, 1) bool
            c = jnp.where((row_f == r_sel) | (col_f == c_sel), _COST_BIG, c)
            hit = (lane1 == k) & ok                                # (1, Gp)
            pacc = jnp.where(hit, r_sel, pacc)
            gacc = jnp.where(hit, c_sel, gacc)
            vacc = jnp.where(hit, 1.0, vacc)
            return c, pacc, gacc, vacc

        zrow = jnp.zeros((1, Gp), jnp.float32)
        _, pacc, gacc, vacc = jax.lax.fori_loop(
            0, g_steps, body, (cost, zrow, zrow, zrow))

        # pack the match record: sublane0=pred idx, 1=gt idx, 2=valid
        sub = jax.lax.broadcasted_iota(jnp.int32, (8, Gp), 0)
        match_ref[...] = (jnp.where(sub == 0, pacc, 0.0)
                          + jnp.where(sub == 1, gacc, 0.0)
                          + jnp.where(sub == 2, vacc, 0.0))
    return kernel


# ----------------------------------------------------------------------------
# Kernel 2: per-layer losses (row-tiled weighted CE + matched L1 / GIoU)
# ----------------------------------------------------------------------------
def _loss_kernel(logits_ref, tcls_ref, w_ref, bb_ref, out_ref, acc_ref):
    r = pl.program_id(1)
    nr = pl.num_programs(1)
    lane = jax.lax.broadcasted_iota(jnp.int32, (1, _LANE), 1)

    @pl.when(r == 0)
    def _():
        acc_ref[...] = jnp.zeros_like(acc_ref)

    # ---- weighted CE partial over this row tile (targets expanded on the
    #      fly from int32 ids; padded rows carry tcls == -1 -> zero weight) ----
    logits = logits_ref[...]                                       # (TR, Cpad)
    tcls = tcls_ref[...]                                           # (TR, 1) i32
    cls_lane = jax.lax.broadcasted_iota(jnp.int32, logits.shape, 1)
    onehot = cls_lane == tcls                                      # (TR, Cpad)
    m = jnp.max(logits, axis=-1, keepdims=True)
    lse = jnp.log(jnp.sum(jnp.exp(logits - m), axis=-1, keepdims=True)) + m
    picked = jnp.sum(jnp.where(onehot, logits, 0.0), axis=-1, keepdims=True)
    w_row = jnp.sum(jnp.where(onehot, w_ref[...], 0.0), axis=-1, keepdims=True)
    num = jnp.sum(w_row * (lse - picked), axis=0, keepdims=True)   # (1, 1)
    den = jnp.sum(w_row, axis=0, keepdims=True)                    # (1, 1)
    acc_ref[...] = (acc_ref[...]
                    + num * (lane == 0).astype(jnp.float32)
                    + den * (lane == 1).astype(jnp.float32))

    @pl.when(r == nr - 1)
    def _():
        acc = acc_ref[...]
        cls_val = acc[:, 0:1] / jnp.maximum(acc[:, 1:2], 1e-12)    # (1, 1)

        # ---- matched bbox losses from the lane-packed (16, BGp) block ----
        bb = bb_ref[...]
        scx = bb[0:1, :]
        scy = bb[1:2, :]
        sw = bb[2:3, :]
        sh = bb[3:4, :]
        tcx = bb[4:5, :]
        tcy = bb[5:6, :]
        tw = bb[6:7, :]
        th = bb[7:8, :]
        msk = bb[8:9, :]
        sx1 = scx - 0.5 * sw
        sy1 = scy - 0.5 * sh
        sx2 = scx + 0.5 * sw
        sy2 = scy + 0.5 * sh
        tx1 = tcx - 0.5 * tw
        ty1 = tcy - 0.5 * th
        tx2 = tcx + 0.5 * tw
        ty2 = tcy + 0.5 * th
        # DETR-style clamp of the box count to >= 1 to avoid NaN on empty GT
        nval = jnp.maximum(jnp.sum(msk, axis=1, keepdims=True), 1.0)

        l1 = (jnp.abs(sx1 - tx1) + jnp.abs(sy1 - ty1)
              + jnp.abs(sx2 - tx2) + jnp.abs(sy2 - ty2))           # (1, BGp)
        l1_val = jnp.sum(msk * l1, axis=1, keepdims=True) / nval

        iw = jnp.maximum(jnp.minimum(sx2, tx2) - jnp.maximum(sx1, tx1), 0.0)
        ih = jnp.maximum(jnp.minimum(sy2, ty2) - jnp.maximum(sy1, ty1), 0.0)
        inter = iw * ih
        union = (sx2 - sx1) * (sy2 - sy1) + (tx2 - tx1) * (ty2 - ty1) - inter
        iou = inter / (union + _EPS)
        earea = ((jnp.maximum(sx2, tx2) - jnp.minimum(sx1, tx1)) *
                 (jnp.maximum(sy2, ty2) - jnp.minimum(sy1, ty1)))
        giou = iou - (earea - union) / (earea + _EPS)
        giou_val = jnp.sum(msk * (1.0 - giou), axis=1, keepdims=True) / nval

        out_ref[...] = (cls_val * (lane == 0).astype(jnp.float32)
                        + l1_val * (lane == 1).astype(jnp.float32)
                        + giou_val * (lane == 2).astype(jnp.float32))


# ----------------------------------------------------------------------------
# Jittable end-to-end forward (all decoder layers stacked on a leading L axis)
# ----------------------------------------------------------------------------
def _detr_loss_impl(labels_stack, bboxes_stack, gt_labels, gt_bboxes, gt_mask,
                    cls_w, *, class_weight, bbox_weight, giou_weight, bg_index):
    L, B, Q, Cp1 = labels_stack.shape
    G = gt_labels.shape[1]
    Cpad = _round_up(Cp1, _LANE)
    Gp = _round_up(G, _LANE)
    Qp = _round_up(Q, 8)
    if Qp > 512:                       # keep kernel-2 row tiles VMEM-friendly
        Qp = _round_up(Qp, 512)
        row_tile = 512
    else:
        row_tile = Qp
    BG = B * G
    BGp = _round_up(BG, _LANE)

    labels_f32 = labels_stack.astype(jnp.float32)
    bboxes_f32 = bboxes_stack.astype(jnp.float32)
    gt_bboxes_f32 = gt_bboxes.astype(jnp.float32)
    maskf = gt_mask.astype(jnp.float32)

    # logits padded with a large *finite* negative value: padded class lanes
    # get ~0 probability, padded query rows carry zero CE weight (tcls = -1).
    logits_pad = jnp.pad(labels_f32,
                         ((0, 0), (0, 0), (0, Qp - Q), (0, Cpad - Cp1)),
                         constant_values=_NEG_LARGE)
    pbox_pad = jnp.pad(bboxes_f32, ((0, 0), (0, 0), (0, Qp - Q), (0, 0)))

    # per-image GT block: sublanes = [cx, cy, w, h, valid, 0, 0, 0]
    gt_bbt = jnp.transpose(gt_bboxes_f32, (0, 2, 1))                  # (B, 4, G)
    gpack = jnp.concatenate(
        [gt_bbt, maskf[:, None, :], jnp.zeros((B, 3, G), jnp.float32)], axis=1)
    gpack = jnp.pad(gpack, ((0, 0), (0, 0), (0, Gp - G)))             # (B, 8, Gp)

    # GT label one-hot (transposed, invalid slots zeroed) for the class cost
    goh = jax.nn.one_hot(gt_labels, Cpad, dtype=jnp.float32) * maskf[..., None]
    goh_t = jnp.pad(jnp.transpose(goh, (0, 2, 1)),
                    ((0, 0), (0, 0), (0, Gp - G)))                    # (B,Cpad,Gp)

    # ---- kernel 1: fused matching cost + greedy assignment, grid (B, L) ----
    match = pl.pallas_call(
        _make_match_kernel(class_weight, bbox_weight, giou_weight, Q, G),
        out_shape=jax.ShapeDtypeStruct((L, B, 8, Gp), jnp.float32),
        grid=(B, L),
        in_specs=[
            pl.BlockSpec((None, None, Qp, Cpad), lambda b, l: (l, b, 0, 0)),
            pl.BlockSpec((None, None, Qp, 4), lambda b, l: (l, b, 0, 0)),
            pl.BlockSpec((None, 8, Gp), lambda b, l: (b, 0, 0)),
            pl.BlockSpec((None, Cpad, Gp), lambda b, l: (b, 0, 0)),
        ],
        out_specs=pl.BlockSpec((None, None, 8, Gp), lambda b, l: (l, b, 0, 0)),
        compiler_params=pltpu.CompilerParams(
            dimension_semantics=("parallel", "parallel"),
            vmem_limit_bytes=32 * 1024 * 1024),
    )(logits_pad, pbox_pad, gpack, goh_t)

    pidx = match[:, :, 0, :G].astype(jnp.int32)                       # (L, B, G)
    gidx = match[:, :, 1, :G].astype(jnp.int32)
    pval = match[:, :, 2, :G]

    # ---- tiny per-(layer, image) gathers / scatter (plain JAX, on device) ----
    def _targets_one(pidx_b, gidx_b, pval_b, gtl_b, gtb_b, pb_lb):
        matched_labels = gtl_b[gidx_b]                                # (G,)
        scat = jnp.where(pval_b > 0.5, pidx_b, jnp.int32(Q))          # OOB drop
        tcls = jnp.full((Q,), bg_index, dtype=jnp.int32)
        tcls = tcls.at[scat].set(matched_labels, mode='drop')
        return tcls, pb_lb[pidx_b], gtb_b[gidx_b]

    per_batch = jax.vmap(_targets_one, in_axes=(0, 0, 0, 0, 0, 0))
    per_layer = jax.vmap(per_batch, in_axes=(0, 0, 0, None, None, 0))
    tcls, src_bb, tgt_bb = per_layer(pidx, gidx, pval, gt_labels,
                                     gt_bboxes_f32, bboxes_f32)

    tcls_pad = jnp.pad(tcls, ((0, 0), (0, 0), (0, Qp - Q)), constant_values=-1)
    tcls_flat = tcls_pad.reshape(L, B * Qp, 1)
    logits_flat = logits_pad.reshape(L, B * Qp, Cpad)

    # lane-packed matched boxes: sublanes = [src cxcywh, tgt cxcywh, valid, 0..]
    src_t = jnp.transpose(src_bb.reshape(L, BG, 4), (0, 2, 1))
    tgt_t = jnp.transpose(tgt_bb.reshape(L, BG, 4), (0, 2, 1))
    bbpack = jnp.concatenate(
        [src_t, tgt_t, pval.reshape(L, 1, BG),
         jnp.zeros((L, 7, BG), jnp.float32)], axis=1)                 # (L,16,BG)
    bbpack = jnp.pad(bbpack, ((0, 0), (0, 0), (0, BGp - BG)))

    # ---- kernel 2: per-layer losses, row-tiled CE + matched box losses ----
    n_row = (B * Qp) // row_tile
    out = pl.pallas_call(
        _loss_kernel,
        out_shape=jax.ShapeDtypeStruct((L, 1, _LANE), jnp.float32),
        grid=(L, n_row),
        in_specs=[
            pl.BlockSpec((None, row_tile, Cpad), lambda l, r: (l, r, 0)),
            pl.BlockSpec((None, row_tile, 1), lambda l, r: (l, r, 0)),
            pl.BlockSpec((1, Cpad), lambda l, r: (0, 0)),
            pl.BlockSpec((None, 16, BGp), lambda l, r: (l, 0, 0)),
        ],
        out_specs=pl.BlockSpec((None, 1, _LANE), lambda l, r: (l, 0, 0)),
        scratch_shapes=[pltpu.VMEM((1, _LANE), jnp.float32)],
        compiler_params=pltpu.CompilerParams(
            dimension_semantics=("parallel", "arbitrary"),
            vmem_limit_bytes=32 * 1024 * 1024),
    )(logits_flat, tcls_flat, cls_w, bbpack)

    cls_l = class_weight * out[:, 0, 0]                               # (L,)
    bb_l = bbox_weight * out[:, 0, 1]
    gi_l = giou_weight * out[:, 0, 2]
    total = cls_l + bb_l + gi_l
    return dict(loss=jnp.sum(total), cls_loss=jnp.sum(cls_l),
                bbox_loss=jnp.sum(bb_l), giou_loss=jnp.sum(gi_l))


# ----------------------------------------------------------------------------
# DETR loss module (JAX / Pallas)
# ----------------------------------------------------------------------------
class DETRLossPallas:
    def __init__(self, num_classes, class_weight, bbox_weight, giou_weight,
                 background_class_weight, background_class_index=0):
        self.num_classes = num_classes
        self.class_weight = float(class_weight)
        self.bbox_weight = float(bbox_weight)
        self.giou_weight = float(giou_weight)
        self.background_class_index = int(background_class_index)
        Cp1 = num_classes + 1
        Cpad = _round_up(Cp1, _LANE)
        w = np.zeros((1, Cpad), np.float32)
        w[0, :Cp1] = 1.0
        w[0, self.background_class_index] = float(background_class_weight)
        self.cls_loss_weights = jnp.asarray(w)
        self._impl = jax.jit(functools.partial(
            _detr_loss_impl,
            class_weight=self.class_weight,
            bbox_weight=self.bbox_weight,
            giou_weight=self.giou_weight,
            bg_index=self.background_class_index))

    def __call__(self, predictions, ground_truth, mask):
        layers = []
        if 'auxiliary_outputs' in predictions:
            layers.extend(predictions['auxiliary_outputs'])
        layers.append(dict(labels=predictions['labels'],
                           bboxes=predictions['bboxes']))
        labels_stack = jnp.stack([p['labels'] for p in layers], axis=0)   # (L,B,Q,C+1)
        bboxes_stack = jnp.stack([p['bboxes'] for p in layers], axis=0)   # (L,B,Q,4)
        gt_labels = ground_truth[:, :, 0].astype(jnp.int32)               # (B,G)
        gt_bboxes = ground_truth[:, :, 1:].astype(jnp.float32)            # (B,G,4)
        return self._impl(labels_stack, bboxes_stack, gt_labels, gt_bboxes,
                          mask, self.cls_loss_weights)


# ----------------------------------------------------------------------------
if __name__ == "__main__":
    key = jax.random.PRNGKey(0)
    B, Q, G = 2, 8, 4
    num_classes = 4
    Cp1 = num_classes + 1

    k1, k2, k3, k4, k5, k6 = jax.random.split(key, 6)

    def rand_boxes(k, shape):
        kc, ks = jax.random.split(k)
        cxcy = jax.random.uniform(kc, shape[:-1] + (2,), minval=0.3, maxval=0.7)
        wh = jax.random.uniform(ks, shape[:-1] + (2,), minval=0.1, maxval=0.3)
        return jnp.concatenate([cxcy, wh], axis=-1).astype(jnp.float32)

    main_logits = jax.random.normal(k1, (B, Q, Cp1), jnp.float32)
    main_bboxes = rand_boxes(k2, (B, Q, 4))
    aux_logits = jax.random.normal(k3, (B, Q, Cp1), jnp.float32)
    aux_bboxes = rand_boxes(k4, (B, Q, 4))

    gt_labels = jax.random.randint(k5, (B, G, 1), 1, num_classes + 1).astype(jnp.float32)
    gt_boxes = rand_boxes(k6, (B, G, 4))
    ground_truth = jnp.concatenate([gt_labels, gt_boxes], axis=-1)        # (B,G,5)
    mask = jnp.array([[True, True, True, False],
                      [True, True, True, True]])

    predictions = dict(
        labels=main_logits,
        bboxes=main_bboxes,
        auxiliary_outputs=[dict(labels=aux_logits, bboxes=aux_bboxes)],
    )

    loss_mod = DETRLossPallas(num_classes=num_classes, class_weight=1,
                              bbox_weight=5, giou_weight=2,
                              background_class_weight=0.1,
                              background_class_index=0)

    losses = loss_mod(predictions, ground_truth, mask)
    for k in ('loss', 'cls_loss', 'bbox_loss', 'giou_loss'):
        jax.block_until_ready(losses[k])
        assert bool(jnp.isfinite(losses[k])), f"non-finite {k}"
    print("KERNEL_OK")
</pallas_src>

<mosaic_0001>
module attributes {stable_mosaic.version = 11 : i64} {
  func.func @kernel(%arg0: i32, %arg1: i32, %arg2: memref<1x1x8x128xf32, #tpu.memory_space<vmem>>, %arg3: memref<1x1x8x4xf32, #tpu.memory_space<vmem>>, %arg4: memref<1x8x128xf32, #tpu.memory_space<vmem>>, %arg5: memref<1x128x128xf32, #tpu.memory_space<vmem>>, %arg6: memref<1x1x8x128xf32, #tpu.memory_space<vmem>>) attributes {dimension_semantics = [#tpu.dimension_semantics<parallel>, #tpu.dimension_semantics<parallel>], iteration_bounds = array<i64: 2, 2>, scalar_prefetch = 0 : i64, scratch_operands = 0 : i64, tpu.core_type = #tpu.core_type<tc>, window_params = [{transform_indices = @transform_0, window_bounds = array<i64: 1, 1, 8, 128>}, {transform_indices = @transform_1, window_bounds = array<i64: 1, 1, 8, 4>}, {transform_indices = @transform_2, window_bounds = array<i64: 1, 8, 128>}, {transform_indices = @transform_3, window_bounds = array<i64: 1, 128, 128>}, {transform_indices = @transform_4, window_bounds = array<i64: 1, 1, 8, 128>}]} {
    %c0 = arith.constant 0 : index
    %c0_0 = arith.constant 0 : index
    %c0_1 = arith.constant 0 : index
    %c0_2 = arith.constant 0 : index
    %0 = vector.load %arg2[%c0, %c0_0, %c0_1, %c0_2] : memref<1x1x8x128xf32, #tpu.memory_space<vmem>>, vector<1x1x8x128xf32>
    %1 = vector.shape_cast %0 : vector<1x1x8x128xf32> to vector<8x128xf32>
    %cst = arith.constant dense<0xFF800000> : vector<8xf32>
    %2 = vector.multi_reduction <maximumf>, %1, %cst [1] : vector<8x128xf32> to vector<8xf32>
    %3 = vector.shape_cast %2 : vector<8xf32> to vector<8x1xf32>
    %4 = vector.broadcast %3 : vector<8x1xf32> to vector<8x128xf32>
    %5 = arith.subf %1, %4 : vector<8x128xf32>
    %6 = math.exp %5 : vector<8x128xf32>
    %cst_3 = arith.constant dense<0.000000e+00> : vector<8xf32>
    %7 = vector.multi_reduction <add>, %6, %cst_3 [1] : vector<8x128xf32> to vector<8xf32>
    %8 = vector.shape_cast %7 : vector<8xf32> to vector<8x1xf32>
    %9 = vector.broadcast %8 : vector<8x1xf32> to vector<8x128xf32>
    %10 = arith.divf %6, %9 : vector<8x128xf32>
    %c0_4 = arith.constant 0 : index
    %c0_5 = arith.constant 0 : index
    %c0_6 = arith.constant 0 : index
    %11 = vector.load %arg5[%c0_4, %c0_5, %c0_6] : memref<1x128x128xf32, #tpu.memory_space<vmem>>, vector<1x128x128xf32>
    %12 = vector.shape_cast %11 : vector<1x128x128xf32> to vector<128x128xf32>
    %cst_7 = arith.constant dense<0.000000e+00> : vector<8x128xf32>
    %13 = tpu.matmul %10, %12, %cst_7 {dimension_numbers = #tpu.dot_dimension_numbers<[1], [0], [0], [1], [0, 0, 1, 1], [], []>} : vector<8x128xf32>, vector<128x128xf32>, vector<8x128xf32> -> vector<8x128xf32>
    %cst_8 = arith.constant -1.000000e+00 : f32
    %14 = vector.broadcast %cst_8 : f32 to vector<8x128xf32>
    %15 = arith.mulf %14, %13 : vector<8x128xf32>
    %c0_9 = arith.constant 0 : index
    %c0_10 = arith.constant 0 : index
    %c0_11 = arith.constant 0 : index
    %c0_12 = arith.constant 0 : index
    %16 = vector.load %arg3[%c0_9, %c0_10, %c0_11, %c0_12] : memref<1x1x8x4xf32, #tpu.memory_space<vmem>>, vector<1x1x8x4xf32>
    %17 = vector.shape_cast %16 : vector<1x1x8x4xf32> to vector<8x4xf32>
    %18 = vector.extract_strided_slice %17 {offsets = [0, 0], sizes = [8, 1], strides = [1, 1]} : vector<8x4xf32> to vector<8x1xf32>
    %19 = vector.extract_strided_slice %17 {offsets = [0, 1], sizes = [8, 1], strides = [1, 1]} : vector<8x4xf32> to vector<8x1xf32>
    %20 = vector.extract_strided_slice %17 {offsets = [0, 2], sizes = [8, 1], strides = [1, 1]} : vector<8x4xf32> to vector<8x1xf32>
    %21 = vector.extract_strided_slice %17 {offsets = [0, 3], sizes = [8, 1], strides = [1, 1]} : vector<8x4xf32> to vector<8x1xf32>
    %c0_13 = arith.constant 0 : index
    %c0_14 = arith.constant 0 : index
    %c0_15 = arith.constant 0 : index
    %22 = vector.load %arg4[%c0_13, %c0_14, %c0_15] : memref<1x8x128xf32, #tpu.memory_space<vmem>>, vector<1x8x128xf32>
    %23 = vector.shape_cast %22 : vector<1x8x128xf32> to vector<8x128xf32>
    %24 = vector.extract_strided_slice %23 {offsets = [0, 0], sizes = [1, 128], strides = [1, 1]} : vector<8x128xf32> to vector<1x128xf32>
    %25 = vector.extract_strided_slice %23 {offsets = [1, 0], sizes = [1, 128], strides = [1, 1]} : vector<8x128xf32> to vector<1x128xf32>
    %26 = vector.extract_strided_slice %23 {offsets = [2, 0], sizes = [1, 128], strides = [1, 1]} : vector<8x128xf32> to vector<1x128xf32>
    %27 = vector.extract_strided_slice %23 {offsets = [3, 0], sizes = [1, 128], strides = [1, 1]} : vector<8x128xf32> to vector<1x128xf32>
    %28 = vector.extract_strided_slice %23 {offsets = [4, 0], sizes = [1, 128], strides = [1, 1]} : vector<8x128xf32> to vector<1x128xf32>
    %29 = vector.broadcast %18 : vector<8x1xf32> to vector<8x128xf32>
    %30 = vector.broadcast %24 : vector<1x128xf32> to vector<8x128xf32>
    %31 = arith.subf %29, %30 : vector<8x128xf32>
    %32 = math.absf %31 : vector<8x128xf32>
    %33 = vector.broadcast %19 : vector<8x1xf32> to vector<8x128xf32>
    %34 = vector.broadcast %25 : vector<1x128xf32> to vector<8x128xf32>
    %35 = arith.subf %33, %34 : vector<8x128xf32>
    %36 = math.absf %35 : vector<8x128xf32>
    %37 = arith.addf %32, %36 : vector<8x128xf32>
    %38 = vector.broadcast %20 : vector<8x1xf32> to vector<8x128xf32>
    %39 = vector.broadcast %26 : vector<1x128xf32> to vector<8x128xf32>
    %40 = arith.subf %38, %39 : vector<8x128xf32>
    %41 = math.absf %40 : vector<8x128xf32>
    %42 = arith.addf %37, %41 : vector<8x128xf32>
    %43 = vector.broadcast %21 : vector<8x1xf32> to vector<8x128xf32>
    %44 = vector.broadcast %27 : vector<1x128xf32> to vector<8x128xf32>
    %45 = arith.subf %43, %44 : vector<8x128xf32>
    %46 = math.absf %45 : vector<8x128xf32>
    %47 = arith.addf %42, %46 : vector<8x128xf32>
    %cst_16 = arith.constant 5.000000e+00 : f32
    %48 = vector.broadcast %cst_16 : f32 to vector<8x128xf32>
    %49 = arith.mulf %48, %47 : vector<8x128xf32>
    %50 = arith.addf %15, %49 : vector<8x128xf32>
    %cst_17 = arith.constant 5.000000e-01 : f32
    %51 = vector.broadcast %cst_17 : f32 to vector<8x1xf32>
    %52 = arith.mulf %51, %20 : vector<8x1xf32>
    %53 = arith.subf %18, %52 : vector<8x1xf32>
    %cst_18 = arith.constant 5.000000e-01 : f32
    %54 = vector.broadcast %cst_18 : f32 to vector<8x1xf32>
    %55 = arith.mulf %54, %21 : vector<8x1xf32>
    %56 = arith.subf %19, %55 : vector<8x1xf32>
    %cst_19 = arith.constant 5.000000e-01 : f32
    %57 = vector.broadcast %cst_19 : f32 to vector<8x1xf32>
    %58 = arith.mulf %57, %20 : vector<8x1xf32>
    %59 = arith.addf %18, %58 : vector<8x1xf32>
    %cst_20 = arith.constant 5.000000e-01 : f32
    %60 = vector.broadcast %cst_20 : f32 to vector<8x1xf32>
    %61 = arith.mulf %60, %21 : vector<8x1xf32>
    %62 = arith.addf %19, %61 : vector<8x1xf32>
    %cst_21 = arith.constant 5.000000e-01 : f32
    %63 = vector.broadcast %cst_21 : f32 to vector<1x128xf32>
    %64 = arith.mulf %63, %26 : vector<1x128xf32>
    %65 = arith.subf %24, %64 : vector<1x128xf32>
    %cst_22 = arith.constant 5.000000e-01 : f32
    %66 = vector.broadcast %cst_22 : f32 to vector<1x128xf32>
    %67 = arith.mulf %66, %27 : vector<1x128xf32>
    %68 = arith.subf %25, %67 : vector<1x128xf32>
    %cst_23 = arith.constant 5.000000e-01 : f32
    %69 = vector.broadcast %cst_23 : f32 to vector<1x128xf32>
    %70 = arith.mulf %69, %26 : vector<1x128xf32>
    %71 = arith.addf %24, %70 : vector<1x128xf32>
    %cst_24 = arith.constant 5.000000e-01 : f32
    %72 = vector.broadcast %cst_24 : f32 to vector<1x128xf32>
    %73 = arith.mulf %72, %27 : vector<1x128xf32>
    %74 = arith.addf %25, %73 : vector<1x128xf32>
    %75 = vector.broadcast %59 : vector<8x1xf32> to vector<8x128xf32>
    %76 = vector.broadcast %71 : vector<1x128xf32> to vector<8x128xf32>
    %77 = arith.minimumf %75, %76 : vector<8x128xf32>
    %78 = vector.broadcast %53 : vector<8x1xf32> to vector<8x128xf32>
    %79 = vector.broadcast %65 : vector<1x128xf32> to vector<8x128xf32>
    %80 = arith.maximumf %78, %79 : vector<8x128xf32>
    %81 = arith.subf %77, %80 : vector<8x128xf32>
    %cst_25 = arith.constant 0.000000e+00 : f32
    %82 = vector.broadcast %cst_25 : f32 to vector<8x128xf32>
    %83 = arith.maximumf %81, %82 : vector<8x128xf32>
    %84 = vector.broadcast %62 : vector<8x1xf32> to vector<8x128xf32>
    %85 = vector.broadcast %74 : vector<1x128xf32> to vector<8x128xf32>
    %86 = arith.minimumf %84, %85 : vector<8x128xf32>
    %87 = vector.broadcast %56 : vector<8x1xf32> to vector<8x128xf32>
    %88 = vector.broadcast %68 : vector<1x128xf32> to vector<8x128xf32>
    %89 = arith.maximumf %87, %88 : vector<8x128xf32>
    %90 = arith.subf %86, %89 : vector<8x128xf32>
    %cst_26 = arith.constant 0.000000e+00 : f32
    %91 = vector.broadcast %cst_26 : f32 to vector<8x128xf32>
    %92 = arith.maximumf %90, %91 : vector<8x128xf32>
    %93 = arith.mulf %83, %92 : vector<8x128xf32>
    %94 = arith.subf %59, %53 : vector<8x1xf32>
    %95 = arith.subf %62, %56 : vector<8x1xf32>
    %96 = arith.mulf %94, %95 : vector<8x1xf32>
    %97 = arith.subf %71, %65 : vector<1x128xf32>
    %98 = arith.subf %74, %68 : vector<1x128xf32>
    %99 = arith.mulf %97, %98 : vector<1x128xf32>
    %100 = vector.broadcast %96 : vector<8x1xf32> to vector<8x128xf32>
    %101 = vector.broadcast %99 : vector<1x128xf32> to vector<8x128xf32>
    %102 = arith.addf %100, %101 : vector<8x128xf32>
    %103 = arith.subf %102, %93 : vector<8x128xf32>
    %cst_27 = arith.constant 1.000000e-07 : f32
    %104 = vector.broadcast %cst_27 : f32 to vector<8x128xf32>
    %105 = arith.addf %103, %104 : vector<8x128xf32>
    %106 = arith.divf %93, %105 : vector<8x128xf32>
    %107 = vector.broadcast %59 : vector<8x1xf32> to vector<8x128xf32>
    %108 = vector.broadcast %71 : vector<1x128xf32> to vector<8x128xf32>
    %109 = arith.maximumf %107, %108 : vector<8x128xf32>
    %110 = vector.broadcast %53 : vector<8x1xf32> to vector<8x128xf32>
    %111 = vector.broadcast %65 : vector<1x128xf32> to vector<8x128xf32>
    %112 = arith.minimumf %110, %111 : vector<8x128xf32>
    %113 = arith.subf %109, %112 : vector<8x128xf32>
    %114 = vector.broadcast %62 : vector<8x1xf32> to vector<8x128xf32>
    %115 = vector.broadcast %74 : vector<1x128xf32> to vector<8x128xf32>
    %116 = arith.maximumf %114, %115 : vector<8x128xf32>
    %117 = vector.broadcast %56 : vector<8x1xf32> to vector<8x128xf32>
    %118 = vector.broadcast %68 : vector<1x128xf32> to vector<8x128xf32>
    %119 = arith.minimumf %117, %118 : vector<8x128xf32>
    %120 = arith.subf %116, %119 : vector<8x128xf32>
    %121 = arith.mulf %113, %120 : vector<8x128xf32>
    %122 = arith.subf %121, %103 : vector<8x128xf32>
    %cst_28 = arith.constant 1.000000e-07 : f32
    %123 = vector.broadcast %cst_28 : f32 to vector<8x128xf32>
    %124 = arith.addf %121, %123 : vector<8x128xf32>
    %125 = arith.divf %122, %124 : vector<8x128xf32>
    %126 = arith.subf %106, %125 : vector<8x128xf32>
    %cst_29 = arith.constant 2.000000e+00 : f32
    %127 = vector.broadcast %cst_29 : f32 to vector<8x128xf32>
    %128 = arith.mulf %127, %126 : vector<8x128xf32>
    %129 = arith.subf %50, %128 : vector<8x128xf32>
    %130 = tpu.iota {dimensions = array<i32: 0>} : vector<8x128xi32>
    %131 = tpu.iota {dimensions = array<i32: 1>} : vector<8x128xi32>
    %cst_30 = arith.constant 1.000000e+00 : f32
    %132 = vector.broadcast %cst_30 : f32 to vector<1x128xf32>
    %133 = arith.subf %132, %28 : vector<1x128xf32>
    %cst_31 = arith.constant 1.000000e+09 : f32
    %134 = vector.broadcast %cst_31 : f32 to vector<1x128xf32>
    %135 = arith.mulf %133, %134 : vector<1x128xf32>
    %136 = vector.broadcast %135 : vector<1x128xf32> to vector<8x128xf32>
    %137 = arith.addf %129, %136 : vector<8x128xf32>
    %c8_i32 = arith.constant 8 : i32
    %138 = vector.broadcast %c8_i32 : i32 to vector<8x128xi32>
    %139 = arith.cmpi sge, %130, %138 : vector<8x128xi32>
    %cst_32 = arith.constant 1.000000e+09 : f32
    %140 = vector.broadcast %cst_32 : f32 to vector<8x128xf32>
    %141 = arith.select %139, %140, %137 : vector<8x128xi1>, vector<8x128xf32>
    %142 = arith.sitofp %130 : vector<8x128xi32> to vector<8x128xf32>
    %143 = arith.sitofp %131 : vector<8x128xi32> to vector<8x128xf32>
    %cst_33 = arith.constant 1.280000e+02 : f32
    %144 = vector.broadcast %cst_33 : f32 to vector<8x128xf32>
    %145 = arith.mulf %142, %144 : vector<8x128xf32>
    %146 = arith.addf %145, %143 : vector<8x128xf32>
    %147 = tpu.iota {dimensions = array<i32: 1>} : vector<1x128xi32>
    %cst_34 = arith.constant 0.000000e+00 : f32
    %148 = vector.broadcast %cst_34 : f32 to vector<1x128xf32>
    %c0_i32 = arith.constant 0 : i32
    %c4_i32 = arith.constant 4 : i32
    %149 = arith.addi %c0_i32, %c4_i32 : i32
    %c1_i32 = arith.constant 1 : i32
    %150:4 = scf.for %arg7 = %c0_i32 to %149 step %c1_i32 iter_args(%arg8 = %141, %arg9 = %148, %arg10 = %148, %arg11 = %148) -> (vector<8x128xf32>, vector<1x128xf32>, vector<1x128xf32>, vector<1x128xf32>)  : i32 {
      %175 = vector.shape_cast %arg8 : vector<8x128xf32> to vector<1x8x128xf32>
      %cst_45 = arith.constant dense<0x7F800000> : vector<1xf32>
      %176 = vector.multi_reduction <minimumf>, %175, %cst_45 [1, 2] : vector<1x8x128xf32> to vector<1xf32>
      %177 = vector.shape_cast %176 : vector<1xf32> to vector<1x1x1xf32>
      %178 = vector.extract %177[0, 0, 0] : f32 from vector<1x1x1xf32>
      %179 = vector.broadcast %178 : f32 to vector<1x1xf32>
      %180 = vector.broadcast %179 : vector<1x1xf32> to vector<8x128xf32>
      %181 = arith.cmpf ole, %arg8, %180 : vector<8x128xf32>
      %cst_46 = arith.constant 1.024000e+03 : f32
      %182 = vector.broadcast %cst_46 : f32 to vector<8x128xf32>
      %183 = arith.select %181, %146, %182 : vector<8x128xi1>, vector<8x128xf32>
      %184 = vector.shape_cast %183 : vector<8x128xf32> to vector<1x8x128xf32>
      %cst_47 = arith.constant dense<0x7F800000> : vector<1xf32>
      %185 = vector.multi_reduction <minimumf>, %184, %cst_47 [1, 2] : vector<1x8x128xf32> to vector<1xf32>
      %186 = vector.shape_cast %185 : vector<1xf32> to vector<1x1x1xf32>
      %187 = vector.extract %186[0, 0, 0] : f32 from vector<1x1x1xf32>
      %188 = vector.broadcast %187 : f32 to vector<1x1xf32>
      %cst_48 = arith.constant 1.280000e+02 : f32
      %189 = vector.broadcast %cst_48 : f32 to vector<1x1xf32>
      %190 = arith.divf %188, %189 : vector<1x1xf32>
      %191 = math.floor %190 : vector<1x1xf32>
      %cst_49 = arith.constant 1.280000e+02 : f32
      %192 = vector.broadcast %cst_49 : f32 to vector<1x1xf32>
      %193 = arith.mulf %191, %192 : vector<1x1xf32>
      %194 = arith.subf %188, %193 : vector<1x1xf32>
      %cst_50 = arith.constant 5.000000e+08 : f32
      %195 = vector.broadcast %cst_50 : f32 to vector<1x1xf32>
      %196 = arith.cmpf olt, %179, %195 : vector<1x1xf32>
      %197 = vector.broadcast %191 : vector<1x1xf32> to vector<8x128xf32>
      %198 = arith.cmpf oeq, %142, %197 : vector<8x128xf32>
      %199 = vector.broadcast %194 : vector<1x1xf32> to vector<8x128xf32>
      %200 = arith.cmpf oeq, %143, %199 : vector<8x128xf32>
      %201 = arith.ori %198, %200 : vector<8x128xi1>
      %cst_51 = arith.constant 1.000000e+09 : f32
      %202 = vector.broadcast %cst_51 : f32 to vector<8x128xf32>
      %203 = arith.select %201, %202, %arg8 : vector<8x128xi1>, vector<8x128xf32>
      %204 = vector.broadcast %arg7 : i32 to vector<1x128xi32>
      %205 = arith.cmpi eq, %147, %204 : vector<1x128xi32>
      %206 = vector.broadcast %196 : vector<1x1xi1> to vector<1x128xi1>
      %207 = arith.andi %205, %206 : vector<1x128xi1>
      %208 = vector.shape_cast %191 : vector<1x1xf32> to vector<1x1xf32>
      %209 = vector.broadcast %208 : vector<1x1xf32> to vector<1x128xf32>
      %210 = arith.select %207, %209, %arg9 : vector<1x128xi1>, vector<1x128xf32>
      %211 = vector.shape_cast %194 : vector<1x1xf32> to vector<1x1xf32>
      %212 = vector.broadcast %211 : vector<1x1xf32> to vector<1x128xf32>
      %213 = arith.select %207, %212, %arg10 : vector<1x128xi1>, vector<1x128xf32>
      %cst_52 = arith.constant 1.000000e+00 : f32
      %214 = vector.broadcast %cst_52 : f32 to vector<1x128xf32>
      %215 = arith.select %207, %214, %arg11 : vector<1x128xi1>, vector<1x128xf32>
      scf.yield %203, %210, %213, %215 : vector<8x128xf32>, vector<1x128xf32>, vector<1x128xf32>, vector<1x128xf32>
    }
    %c4_i32_35 = arith.constant 4 : i32
    %151 = tpu.iota {dimensions = array<i32: 0>} : vector<8x128xi32>
    %c0_i32_36 = arith.constant 0 : i32
    %152 = vector.broadcast %c0_i32_36 : i32 to vector<8x128xi32>
    %153 = arith.cmpi eq, %151, %152 : vector<8x128xi32>
    %cst_37 = arith.constant 0.000000e+00 : f32
    %154 = vector.shape_cast %150#1 : vector<1x128xf32> to vector<1x128xf32>
    %155 = vector.broadcast %154 : vector<1x128xf32> to vector<8x128xf32>
    %156 = vector.broadcast %cst_37 : f32 to vector<8x128xf32>
    %157 = arith.select %153, %155, %156 : vector<8x128xi1>, vector<8x128xf32>
    %c1_i32_38 = arith.constant 1 : i32
    %158 = vector.broadcast %c1_i32_38 : i32 to vector<8x128xi32>
    %159 = arith.cmpi eq, %151, %158 : vector<8x128xi32>
    %cst_39 = arith.constant 0.000000e+00 : f32
    %160 = vector.shape_cast %150#2 : vector<1x128xf32> to vector<1x128xf32>
    %161 = vector.broadcast %160 : vector<1x128xf32> to vector<8x128xf32>
    %162 = vector.broadcast %cst_39 : f32 to vector<8x128xf32>
    %163 = arith.select %159, %161, %162 : vector<8x128xi1>, vector<8x128xf32>
    %164 = arith.addf %157, %163 : vector<8x128xf32>
    %c2_i32 = arith.constant 2 : i32
    %165 = vector.broadcast %c2_i32 : i32 to vector<8x128xi32>
    %166 = arith.cmpi eq, %151, %165 : vector<8x128xi32>
    %cst_40 = arith.constant 0.000000e+00 : f32
    %167 = vector.shape_cast %150#3 : vector<1x128xf32> to vector<1x128xf32>
    %168 = vector.broadcast %167 : vector<1x128xf32> to vector<8x128xf32>
    %169 = vector.broadcast %cst_40 : f32 to vector<8x128xf32>
    %170 = arith.select %166, %168, %169 : vector<8x128xi1>, vector<8x128xf32>
    %171 = arith.addf %164, %170 : vector<8x128xf32>
    %c0_41 = arith.constant 0 : index
    %c0_42 = arith.constant 0 : index
    %c0_43 = arith.constant 0 : index
    %c0_44 = arith.constant 0 : index
    %172 = vector.load %arg6[%c0_41, %c0_42, %c0_43, %c0_44] : memref<1x1x8x128xf32, #tpu.memory_space<vmem>>, vector<1x1x8x128xf32>
    %173 = vector.shape_cast %172 : vector<1x1x8x128xf32> to vector<8x128xf32>
    %174 = vector.shape_cast %171 : vector<8x128xf32> to vector<1x1x8x128xf32>
    tpu.vector_store %arg6[%c0_41, %c0_42, %c0_43, %c0_44], %174 {strides = array<i32>} : memref<1x1x8x128xf32, #tpu.memory_space<vmem>>, vector<1x1x8x128xf32>,
    return
  }
  func.func @transform_0(%arg0: i32, %arg1: i32) -> (i32, i32, i32, i32) {
    %c0_i32 = arith.constant 0 : i32
    %c0_i32_0 = arith.constant 0 : i32
    %c0_i32_1 = arith.constant 0 : i32
    return %arg1, %arg0, %c0_i32, %c0_i32_0 : i32, i32, i32, i32
  }
  func.func @transform_1(%arg0: i32, %arg1: i32) -> (i32, i32, i32, i32) {
    %c0_i32 = arith.constant 0 : i32
    %c0_i32_0 = arith.constant 0 : i32
    %c0_i32_1 = arith.constant 0 : i32
    return %arg1, %arg0, %c0_i32, %c0_i32_0 : i32, i32, i32, i32
  }
  func.func @transform_2(%arg0: i32, %arg1: i32) -> (i32, i32, i32) {
    %c0_i32 = arith.constant 0 : i32
    %c0_i32_0 = arith.constant 0 : i32
    %c0_i32_1 = arith.constant 0 : i32
    return %arg0, %c0_i32, %c0_i32_0 : i32, i32, i32
  }
  func.func @transform_3(%arg0: i32, %arg1: i32) -> (i32, i32, i32) {
    %c0_i32 = arith.constant 0 : i32
    %c0_i32_0 = arith.constant 0 : i32
    %c0_i32_1 = arith.constant 0 : i32
    return %arg0, %c0_i32, %c0_i32_0 : i32, i32, i32
  }
  func.func @transform_4(%arg0: i32, %arg1: i32) -> (i32, i32, i32, i32) {
    %c0_i32 = arith.constant 0 : i32
    %c0_i32_0 = arith.constant 0 : i32
    %c0_i32_1 = arith.constant 0 : i32
    return %arg1, %arg0, %c0_i32, %c0_i32_0 : i32, i32, i32, i32
  }
}

module attributes {stable_mosaic.version = 11 : i64} {
  func.func @_loss_kernel(%arg0: i32, %arg1: i32, %arg2: memref<1x8x128xf32, #tpu.memory_space<vmem>>, %arg3: memref<1x8x1xi32, #tpu.memory_space<vmem>>, %arg4: memref<1x128xf32, #tpu.memory_space<vmem>>, %arg5: memref<1x16x128xf32, #tpu.memory_space<vmem>>, %arg6: memref<1x1x128xf32, #tpu.memory_space<vmem>>, %arg7: memref<1x128xf32, #tpu.memory_space<vmem>>) attributes {dimension_semantics = [#tpu.dimension_semantics<parallel>, #tpu.dimension_semantics<arbitrary>], iteration_bounds = array<i64: 2, 2>, scalar_prefetch = 0 : i64, scratch_operands = 1 : i64, tpu.core_type = #tpu.core_type<tc>, window_params = [{transform_indices = @transform_0, window_bounds = array<i64: 1, 8, 128>}, {transform_indices = @transform_1, window_bounds = array<i64: 1, 8, 1>}, {pipeline_mode = #tpu.pipeline_mode<synchronous>, transform_indices = @transform_2, window_bounds = array<i64: 1, 128>}, {transform_indices = @transform_3, window_bounds = array<i64: 1, 16, 128>}, {transform_indices = @transform_4, window_bounds = array<i64: 1, 1, 128>}]} {
    %0 = tpu.iota {dimensions = array<i32: 1>} : vector<1x128xi32>
    %c0_i32 = arith.constant 0 : i32
    %1 = arith.cmpi eq, %arg1, %c0_i32 : i32
    %2 = arith.extui %1 : i1 to i32
    %c0_i32_0 = arith.constant 0 : i32
    %3 = arith.cmpi ne, %2, %c0_i32_0 : i32
    scf.if %3 {
      %cst_22 = arith.constant 0.000000e+00 : f32
      %56 = vector.broadcast %cst_22 : f32 to vector<1x128xf32>
      %c0_23 = arith.constant 0 : index
      %c0_24 = arith.constant 0 : index
      %57 = vector.load %arg7[%c0_23, %c0_24] : memref<1x128xf32, #tpu.memory_space<vmem>>, vector<1x128xf32>
      tpu.vector_store %arg7[%c0_23, %c0_24], %56 {strides = array<i32>} : memref<1x128xf32, #tpu.memory_space<vmem>>, vector<1x128xf32>,
    } else {
    }
    %c0 = arith.constant 0 : index
    %c0_1 = arith.constant 0 : index
    %c0_2 = arith.constant 0 : index
    %4 = vector.load %arg2[%c0, %c0_1, %c0_2] : memref<1x8x128xf32, #tpu.memory_space<vmem>>, vector<1x8x128xf32>
    %5 = vector.shape_cast %4 : vector<1x8x128xf32> to vector<8x128xf32>
    %c0_3 = arith.constant 0 : index
    %c0_4 = arith.constant 0 : index
    %c0_5 = arith.constant 0 : index
    %6 = vector.load %arg3[%c0_3, %c0_4, %c0_5] : memref<1x8x1xi32, #tpu.memory_space<vmem>>, vector<1x8x1xi32>
    %7 = vector.shape_cast %6 : vector<1x8x1xi32> to vector<8x1xi32>
    %8 = tpu.iota {dimensions = array<i32: 1>} : vector<8x128xi32>
    %9 = vector.broadcast %7 : vector<8x1xi32> to vector<8x128xi32>
    %10 = arith.cmpi eq, %8, %9 : vector<8x128xi32>
    %cst = arith.constant dense<0xFF800000> : vector<8xf32>
    %11 = vector.multi_reduction <maximumf>, %5, %cst [1] : vector<8x128xf32> to vector<8xf32>
    %12 = vector.shape_cast %11 : vector<8xf32> to vector<8x1xf32>
    %13 = vector.broadcast %12 : vector<8x1xf32> to vector<8x128xf32>
    %14 = arith.subf %5, %13 : vector<8x128xf32>
    %15 = math.exp %14 : vector<8x128xf32>
    %cst_6 = arith.constant dense<0.000000e+00> : vector<8xf32>
    %16 = vector.multi_reduction <add>, %15, %cst_6 [1] : vector<8x128xf32> to vector<8xf32>
    %17 = vector.shape_cast %16 : vector<8xf32> to vector<8x1xf32>
    %18 = math.log %17 : vector<8x1xf32>
    %19 = arith.addf %18, %12 : vector<8x1xf32>
    %cst_7 = arith.constant 0.000000e+00 : f32
    %20 = vector.broadcast %cst_7 : f32 to vector<8x128xf32>
    %21 = arith.select %10, %5, %20 : vector<8x128xi1>, vector<8x128xf32>
    %cst_8 = arith.constant dense<0.000000e+00> : vector<8xf32>
    %22 = vector.multi_reduction <add>, %21, %cst_8 [1] : vector<8x128xf32> to vector<8xf32>
    %23 = vector.shape_cast %22 : vector<8xf32> to vector<8x1xf32>
    %c0_9 = arith.constant 0 : index
    %c0_10 = arith.constant 0 : index
    %24 = vector.load %arg4[%c0_9, %c0_10] : memref<1x128xf32, #tpu.memory_space<vmem>>, vector<1x128xf32>
    %cst_11 = arith.constant 0.000000e+00 : f32
    %25 = vector.shape_cast %24 : vector<1x128xf32> to vector<1x128xf32>
    %26 = vector.broadcast %25 : vector<1x128xf32> to vector<8x128xf32>
    %27 = vector.broadcast %cst_11 : f32 to vector<8x128xf32>
    %28 = arith.select %10, %26, %27 : vector<8x128xi1>, vector<8x128xf32>
    %cst_12 = arith.constant dense<0.000000e+00> : vector<8xf32>
    %29 = vector.multi_reduction <add>, %28, %cst_12 [1] : vector<8x128xf32> to vector<8xf32>
    %30 = vector.shape_cast %29 : vector<8xf32> to vector<8x1xf32>
    %31 = arith.subf %19, %23 : vector<8x1xf32>
    %32 = arith.mulf %30, %31 : vector<8x1xf32>
    %cst_13 = arith.constant dense<0.000000e+00> : vector<1xf32>
    %33 = vector.multi_reduction <add>, %32, %cst_13 [0] : vector<8x1xf32> to vector<1xf32>
    %34 = vector.shape_cast %33 : vector<1xf32> to vector<1x1xf32>
    %cst_14 = arith.constant dense<0.000000e+00> : vector<1xf32>
    %35 = vector.multi_reduction <add>, %30, %cst_14 [0] : vector<8x1xf32> to vector<1xf32>
    %36 = vector.shape_cast %35 : vector<1xf32> to vector<1x1xf32>
    %c0_15 = arith.constant 0 : index
    %c0_16 = arith.constant 0 : index
    %37 = vector.load %arg7[%c0_15, %c0_16] : memref<1x128xf32, #tpu.memory_space<vmem>>, vector<1x128xf32>
    %c0_i32_17 = arith.constant 0 : i32
    %38 = vector.broadcast %c0_i32_17 : i32 to vector<1x128xi32>
    %39 = arith.cmpi eq, %0, %38 : vector<1x128xi32>
    %40 = arith.extui %39 : vector<1x128xi1> to vector<1x128xi32>
    %41 = arith.sitofp %40 : vector<1x128xi32> to vector<1x128xf32>
    %42 = vector.broadcast %34 : vector<1x1xf32> to vector<1x128xf32>
    %43 = arith.mulf %42, %41 : vector<1x128xf32>
    %44 = arith.addf %37, %43 : vector<1x128xf32>
    %c1_i32 = arith.constant 1 : i32
    %45 = vector.broadcast %c1_i32 : i32 to vector<1x128xi32>
    %46 = arith.cmpi eq, %0, %45 : vector<1x128xi32>
    %47 = arith.extui %46 : vector<1x128xi1> to vector<1x128xi32>
    %48 = arith.sitofp %47 : vector<1x128xi32> to vector<1x128xf32>
    %49 = vector.broadcast %36 : vector<1x1xf32> to vector<1x128xf32>
    %50 = arith.mulf %49, %48 : vector<1x128xf32>
    %51 = arith.addf %44, %50 : vector<1x128xf32>
    %c0_18 = arith.constant 0 : index
    %c0_19 = arith.constant 0 : index
    %52 = vector.load %arg7[%c0_18, %c0_19] : memref<1x128xf32, #tpu.memory_space<vmem>>, vector<1x128xf32>
    tpu.vector_store %arg7[%c0_18, %c0_19], %51 {strides = array<i32>} : memref<1x128xf32, #tpu.memory_space<vmem>>, vector<1x128xf32>,
    %c1_i32_20 = arith.constant 1 : i32
    %53 = arith.cmpi eq, %arg1, %c1_i32_20 : i32
    %54 = arith.extui %53 : i1 to i32
    %c0_i32_21 = arith.constant 0 : i32
    %55 = arith.cmpi ne, %54, %c0_i32_21 : i32
    scf.if %55 {
      %c0_22 = arith.constant 0 : index
      %c0_23 = arith.constant 0 : index
      %56 = vector.load %arg7[%c0_22, %c0_23] : memref<1x128xf32, #tpu.memory_space<vmem>>, vector<1x128xf32>
      %57 = vector.extract_strided_slice %56 {offsets = [0, 0], sizes = [1, 1], strides = [1, 1]} : vector<1x128xf32> to vector<1x1xf32>
      %58 = vector.extract_strided_slice %56 {offsets = [0, 1], sizes = [1, 1], strides = [1, 1]} : vector<1x128xf32> to vector<1x1xf32>
      %cst_24 = arith.constant 9.99999996E-13 : f32
      %59 = vector.broadcast %cst_24 : f32 to vector<1x1xf32>
      %60 = arith.maximumf %58, %59 : vector<1x1xf32>
      %61 = arith.divf %57, %60 : vector<1x1xf32>
      %c0_25 = arith.constant 0 : index
      %c0_26 = arith.constant 0 : index
      %c0_27 = arith.constant 0 : index
      %62 = vector.load %arg5[%c0_25, %c0_26, %c0_27] : memref<1x16x128xf32, #tpu.memory_space<vmem>>, vector<1x16x128xf32>
      %63 = vector.shape_cast %62 : vector<1x16x128xf32> to vector<16x128xf32>
      %64 = vector.extract_strided_slice %63 {offsets = [0, 0], sizes = [1, 128], strides = [1, 1]} : vector<16x128xf32> to vector<1x128xf32>
      %65 = vector.extract_strided_slice %63 {offsets = [1, 0], sizes = [1, 128], strides = [1, 1]} : vector<16x128xf32> to vector<1x128xf32>
      %66 = vector.extract_strided_slice %63 {offsets = [2, 0], sizes = [1, 128], strides = [1, 1]} : vector<16x128xf32> to vector<1x128xf32>
      %67 = vector.extract_strided_slice %63 {offsets = [3, 0], sizes = [1, 128], strides = [1, 1]} : vector<16x128xf32> to vector<1x128xf32>
      %68 = vector.extract_strided_slice %63 {offsets = [4, 0], sizes = [1, 128], strides = [1, 1]} : vector<16x128xf32> to vector<1x128xf32>
      %69 = vector.extract_strided_slice %63 {offsets = [5, 0], sizes = [1, 128], strides = [1, 1]} : vector<16x128xf32> to vector<1x128xf32>
      %70 = vector.extract_strided_slice %63 {offsets = [6, 0], sizes = [1, 128], strides = [1, 1]} : vector<16x128xf32> to vector<1x128xf32>
      %71 = vector.extract_strided_slice %63 {offsets = [7, 0], sizes = [1, 128], strides = [1, 1]} : vector<16x128xf32> to vector<1x128xf32>
      %72 = vector.extract_strided_slice %63 {offsets = [8, 0], sizes = [1, 128], strides = [1, 1]} : vector<16x128xf32> to vector<1x128xf32>
      %cst_28 = arith.constant 5.000000e-01 : f32
      %73 = vector.broadcast %cst_28 : f32 to vector<1x128xf32>
      %74 = arith.mulf %73, %66 : vector<1x128xf32>
      %75 = arith.subf %64, %74 : vector<1x128xf32>
      %cst_29 = arith.constant 5.000000e-01 : f32
      %76 = vector.broadcast %cst_29 : f32 to vector<1x128xf32>
      %77 = arith.mulf %76, %67 : vector<1x128xf32>
      %78 = arith.subf %65, %77 : vector<1x128xf32>
      %cst_30 = arith.constant 5.000000e-01 : f32
      %79 = vector.broadcast %cst_30 : f32 to vector<1x128xf32>
      %80 = arith.mulf %79, %66 : vector<1x128xf32>
      %81 = arith.addf %64, %80 : vector<1x128xf32>
      %cst_31 = arith.constant 5.000000e-01 : f32
      %82 = vector.broadcast %cst_31 : f32 to vector<1x128xf32>
      %83 = arith.mulf %82, %67 : vector<1x128xf32>
      %84 = arith.addf %65, %83 : vector<1x128xf32>
      %cst_32 = arith.constant 5.000000e-01 : f32
      %85 = vector.broadcast %cst_32 : f32 to vector<1x128xf32>
      %86 = arith.mulf %85, %70 : vector<1x128xf32>
      %87 = arith.subf %68, %86 : vector<1x128xf32>
      %cst_33 = arith.constant 5.000000e-01 : f32
      %88 = vector.broadcast %cst_33 : f32 to vector<1x128xf32>
      %89 = arith.mulf %88, %71 : vector<1x128xf32>
      %90 = arith.subf %69, %89 : vector<1x128xf32>
      %cst_34 = arith.constant 5.000000e-01 : f32
      %91 = vector.broadcast %cst_34 : f32 to vector<1x128xf32>
      %92 = arith.mulf %91, %70 : vector<1x128xf32>
      %93 = arith.addf %68, %92 : vector<1x128xf32>
      %cst_35 = arith.constant 5.000000e-01 : f32
      %94 = vector.broadcast %cst_35 : f32 to vector<1x128xf32>
      %95 = arith.mulf %94, %71 : vector<1x128xf32>
      %96 = arith.addf %69, %95 : vector<1x128xf32>
      %cst_36 = arith.constant dense<0.000000e+00> : vector<1xf32>
      %97 = vector.multi_reduction <add>, %72, %cst_36 [1] : vector<1x128xf32> to vector<1xf32>
      %98 = vector.shape_cast %97 : vector<1xf32> to vector<1x1xf32>
      %cst_37 = arith.constant 1.000000e+00 : f32
      %99 = vector.broadcast %cst_37 : f32 to vector<1x1xf32>
      %100 = arith.maximumf %98, %99 : vector<1x1xf32>
      %101 = arith.subf %75, %87 : vector<1x128xf32>
      %102 = math.absf %101 : vector<1x128xf32>
      %103 = arith.subf %78, %90 : vector<1x128xf32>
      %104 = math.absf %103 : vector<1x128xf32>
      %105 = arith.addf %102, %104 : vector<1x128xf32>
      %106 = arith.subf %81, %93 : vector<1x128xf32>
      %107 = math.absf %106 : vector<1x128xf32>
      %108 = arith.addf %105, %107 : vector<1x128xf32>
      %109 = arith.subf %84, %96 : vector<1x128xf32>
      %110 = math.absf %109 : vector<1x128xf32>
      %111 = arith.addf %108, %110 : vector<1x128xf32>
      %112 = arith.mulf %72, %111 : vector<1x128xf32>
      %cst_38 = arith.constant dense<0.000000e+00> : vector<1xf32>
      %113 = vector.multi_reduction <add>, %112, %cst_38 [1] : vector<1x128xf32> to vector<1xf32>
      %114 = vector.shape_cast %113 : vector<1xf32> to vector<1x1xf32>
      %115 = arith.divf %114, %100 : vector<1x1xf32>
      %116 = arith.minimumf %81, %93 : vector<1x128xf32>
      %117 = arith.maximumf %75, %87 : vector<1x128xf32>
      %118 = arith.subf %116, %117 : vector<1x128xf32>
      %cst_39 = arith.constant 0.000000e+00 : f32
      %119 = vector.broadcast %cst_39 : f32 to vector<1x128xf32>
      %120 = arith.maximumf %118, %119 : vector<1x128xf32>
      %121 = arith.minimumf %84, %96 : vector<1x128xf32>
      %122 = arith.maximumf %78, %90 : vector<1x128xf32>
      %123 = arith.subf %121, %122 : vector<1x128xf32>
      %cst_40 = arith.constant 0.000000e+00 : f32
      %124 = vector.broadcast %cst_40 : f32 to vector<1x128xf32>
      %125 = arith.maximumf %123, %124 : vector<1x128xf32>
      %126 = arith.mulf %120, %125 : vector<1x128xf32>
      %127 = arith.subf %81, %75 : vector<1x128xf32>
      %128 = arith.subf %84, %78 : vector<1x128xf32>
      %129 = arith.mulf %127, %128 : vector<1x128xf32>
      %130 = arith.subf %93, %87 : vector<1x128xf32>
      %131 = arith.subf %96, %90 : vector<1x128xf32>
      %132 = arith.mulf %130, %131 : vector<1x128xf32>
      %133 = arith.addf %129, %132 : vector<1x128xf32>
      %134 = arith.subf %133, %126 : vector<1x128xf32>
      %cst_41 = arith.constant 1.000000e-07 : f32
      %135 = vector.broadcast %cst_41 : f32 to vector<1x128xf32>
      %136 = arith.addf %134, %135 : vector<1x128xf32>
      %137 = arith.divf %126, %136 : vector<1x128xf32>
      %138 = arith.maximumf %81, %93 : vector<1x128xf32>
      %139 = arith.minimumf %75, %87 : vector<1x128xf32>
      %140 = arith.subf %138, %139 : vector<1x128xf32>
      %141 = arith.maximumf %84, %96 : vector<1x128xf32>
      %142 = arith.minimumf %78, %90 : vector<1x128xf32>
      %143 = arith.subf %141, %142 : vector<1x128xf32>
      %144 = arith.mulf %140, %143 : vector<1x128xf32>
      %145 = arith.subf %144, %134 : vector<1x128xf32>
      %cst_42 = arith.constant 1.000000e-07 : f32
      %146 = vector.broadcast %cst_42 : f32 to vector<1x128xf32>
      %147 = arith.addf %144, %146 : vector<1x128xf32>
      %148 = arith.divf %145, %147 : vector<1x128xf32>
      %149 = arith.subf %137, %148 : vector<1x128xf32>
      %cst_43 = arith.constant 1.000000e+00 : f32
      %150 = vector.broadcast %cst_43 : f32 to vector<1x128xf32>
      %151 = arith.subf %150, %149 : vector<1x128xf32>
      %152 = arith.mulf %72, %151 : vector<1x128xf32>
      %cst_44 = arith.constant dense<0.000000e+00> : vector<1xf32>
      %153 = vector.multi_reduction <add>, %152, %cst_44 [1] : vector<1x128xf32> to vector<1xf32>
      %154 = vector.shape_cast %153 : vector<1xf32> to vector<1x1xf32>
      %155 = arith.divf %154, %100 : vector<1x1xf32>
      %c0_i32_45 = arith.constant 0 : i32
      %156 = vector.broadcast %c0_i32_45 : i32 to vector<1x128xi32>
      %157 = arith.cmpi eq, %0, %156 : vector<1x128xi32>
      %158 = arith.extui %157 : vector<1x128xi1> to vector<1x128xi32>
      %159 = arith.sitofp %158 : vector<1x128xi32> to vector<1x128xf32>
      %160 = vector.broadcast %61 : vector<1x1xf32> to vector<1x128xf32>
      %161 = arith.mulf %160, %159 : vector<1x128xf32>
      %c1_i32_46 = arith.constant 1 : i32
      %162 = vector.broadcast %c1_i32_46 : i32 to vector<1x128xi32>
      %163 = arith.cmpi eq, %0, %162 : vector<1x128xi32>
      %164 = arith.extui %163 : vector<1x128xi1> to vector<1x128xi32>
      %165 = arith.sitofp %164 : vector<1x128xi32> to vector<1x128xf32>
      %166 = vector.broadcast %115 : vector<1x1xf32> to vector<1x128xf32>
      %167 = arith.mulf %166, %165 : vector<1x128xf32>
      %168 = arith.addf %161, %167 : vector<1x128xf32>
      %c2_i32 = arith.constant 2 : i32
      %169 = vector.broadcast %c2_i32 : i32 to vector<1x128xi32>
      %170 = arith.cmpi eq, %0, %169 : vector<1x128xi32>
      %171 = arith.extui %170 : vector<1x128xi1> to vector<1x128xi32>
      %172 = arith.sitofp %171 : vector<1x128xi32> to vector<1x128xf32>
      %173 = vector.broadcast %155 : vector<1x1xf32> to vector<1x128xf32>
      %174 = arith.mulf %173, %172 : vector<1x128xf32>
      %175 = arith.addf %168, %174 : vector<1x128xf32>
      %c0_47 = arith.constant 0 : index
      %c0_48 = arith.constant 0 : index
      %c0_49 = arith.constant 0 : index
      %176 = vector.load %arg6[%c0_47, %c0_48, %c0_49] : memref<1x1x128xf32, #tpu.memory_space<vmem>>, vector<1x1x128xf32>
      %177 = vector.shape_cast %176 : vector<1x1x128xf32> to vector<1x128xf32>
      %178 = vector.shape_cast %175 : vector<1x128xf32> to vector<1x1x128xf32>
      tpu.vector_store %arg6[%c0_47, %c0_48, %c0_49], %178 {strides = array<i32>} : memref<1x1x128xf32, #tpu.memory_space<vmem>>, vector<1x1x128xf32>,
    } else {
    }
    return
  }
  func.func @transform_0(%arg0: i32, %arg1: i32) -> (i32, i32, i32) {
    %c0_i32 = arith.constant 0 : i32
    %c0_i32_0 = arith.constant 0 : i32
    return %arg0, %arg1, %c0_i32 : i32, i32, i32
  }
  func.func @transform_1(%arg0: i32, %arg1: i32) -> (i32, i32, i32) {
    %c0_i32 = arith.constant 0 : i32
    %c0_i32_0 = arith.constant 0 : i32
    return %arg0, %arg1, %c0_i32 : i32, i32, i32
  }
  func.func @transform_2(%arg0: i32, %arg1: i32) -> (i32, i32) {
    %c0_i32 = arith.constant 0 : i32
    %c0_i32_0 = arith.constant 0 : i32
    %c0_i32_1 = arith.constant 0 : i32
    return %c0_i32, %c0_i32_0 : i32, i32
  }
  func.func @transform_3(%arg0: i32, %arg1: i32) -> (i32, i32, i32) {
    %c0_i32 = arith.constant 0 : i32
    %c0_i32_0 = arith.constant 0 : i32
    %c0_i32_1 = arith.constant 0 : i32
    return %arg0, %c0_i32, %c0_i32_0 : i32, i32, i32
  }
  func.func @transform_4(%arg0: i32, %arg1: i32) -> (i32, i32, i32) {
    %c0_i32 = arith.constant 0 : i32
    %c0_i32_0 = arith.constant 0 : i32
    %c0_i32_1 = arith.constant 0 : i32
    return %arg0, %c0_i32, %c0_i32_0 : i32, i32, i32
  }
}

</mosaic_0001>

<bundles_post_ra>
// kernel: squeeze.10
= control target key start
LH: loop header
LB: loop body
LE: loop exit
PB: predicated region body
PF: predicated region fallthrough
CT: control target
= control target key end

     0   :  { %s10_s10 = smov 3  ;;  %vm12_vm0 = vcmask 31744   ;;  %s29_s11 = smov 4   ;;  %vm19_vm1 = vcmask 64544   ;;  %s49_s0 = inlined_call_operand.vmem [shape: f32[2,2,4], index: 0, kind: input, shape index: {}]   ;;  %s50_s1 = inlined_call_operand.vmem [shape: f32[2,1,8], index: 1, kind: output, shape index: {}]  }
   0x1   :  { %v27_v0 = vld [vmem:[%s49_s0 + $0x2] sm:$0x3]  ;;  %v8_v1 = vld [vmem:[%s49_s0] sm:$0x3]  ;;  %s15_s0 = smov 3 }
   0x2   :  { %7 = vst [vmem:[#allocation1 + $0x8] sm:$0x3] %v27_v0  ;;  %9 = vst [vmem:[#allocation1] sm:$0x3] %v8_v1 }
   0x9   :  { %v16_v2 = vld [vmem:[#allocation1 + $0x1] ss:$8 sm:%s15_s0]   ;;  %v11_v3 = vld [vmem:[#allocation1] ss:$8 sm:%s10_s10]  }
   0xa   :  { %17 = vrot.lane.b32.xlu0 %v16_v2, %s29_s11  ;;  %13 = vst.msk [vmem:[#allocation0] sm:$0x3] %vm12_vm0, %v11_v3  }
  0x7c   :  { %v18_v4 = vpop.permute.xlu0 %17  }
  0x7d   :  { %20 = vst.msk [vmem:[#allocation0] sm:$0x3] %vm19_vm1, %v18_v4  }
  0x84   :  { %v24_v5 = vld [vmem:[#allocation0] sm:$0x3] }
  0x85   :  { %26 = vst [vmem:[%s50_s1] sm:$0x3] %v24_v5 }

// kernel: _detr_loss_impl.2
= control target key start
LH: loop header
LB: loop body
LE: loop exit
PB: predicated region body
PF: predicated region fallthrough
CT: control target
= control target key end

     0   :  { %s1073_s15 = smov 0   ;;  %s1075_s16 = smov 0   ;;  %s1230_s0 = inlined_call_operand.vmem [shape: f32[2,2,8,128], index: 0, kind: input, shape index: {}]   ;;  %s1231_s1 = inlined_call_operand.vmem [shape: f32[2,2,8,4], index: 1, kind: input, shape index: {}]   ;;  %s1232_s2 = inlined_call_operand.vmem [shape: f32[2,8,128], index: 2, kind: input, shape index: {}]   ;;  %s1233_s3 = inlined_call_operand.vmem [shape: f32[2,128,128], index: 3, kind: input, shape index: {}]   ;;  %s1234_s4 = inlined_call_operand.vmem [shape: f32[2,2,8,128], index: 4, kind: output, shape index: {}]  }
   0x1   :  { %s1077_s17 = smov 0   ;;  %s1079_s18 = smov 0  }
   0x2   :  { %s1081_s19 = smov 0  }
   0x3 LB: > { %s23_s20 = sadd.s32 1, %s1009_s17  ;;  %s26_s21 = sadd.s32 1, %s1013_s18  ;;  %s1017_s19 = sphi %s1081_s19, %s14_s19   ;;  %s1013_s18 = sphi %s1079_s18, %s1240_s18   ;;  %s1009_s17 = sphi %s1077_s17, %s1239_s17   ;;  %s1005_s16 = sphi %s1075_s16, %s1238_s16   ;;  %s1001_s15 = sphi %s1073_s15, %s1237_s15  }
   0x4   : > { %p24_p0 = scmp.ge.s32.totalorder %s23_s20, 2  ;;  %p762_p1 = scmp.ge.s32.totalorder %s1017_s19, 1 }
   0x5   : > { %p215_p2 = scmp.lt.s32.totalorder %s1017_s19, 5 }
   0x6   : > { %s1242_s20 = smov (%p24_p0, %s23_s20), 0  ;;  %s1244_s21 = smov (!%p24_p0, %s26_s21), %s1013_s18 }
   0x7   : > { %p216_p3 = pnand %p762_p1, %p215_p2  ;;  %p28_p4 = scmp.ge.s32.totalorder %s1244_s21, 2 }
   0x8   : > { %p264_p5 = scmp.lt.s32.totalorder (!%p216_p3), %s1001_s15, 1  ;;  %p266_p6 = scmp.lt.s32.totalorder (!%p216_p3), %s1005_s16, 1  ;;  %v1040_v3 = vmov (!%p216_p3), 0   ;;  %v1041_v7 = vmov (!%p216_p3), 0.0|0.0   ;;  %v1043_v24 = vmov (!%p216_p3), 1   ;;  %vm1044_vm0 = vmmov (!%p216_p3), 0  }
   0x9   : > { %s1246_s21 = smov (%p28_p4, %s1244_s21), 0  ;;  %219 = sbr.rel (%p216_p3) target bundleno = 982 (0x3d6), region = 36 }
   0xa   : > { %s1039_s8 = smov (!%p216_p3), 126   ;;  %945 = vset.pattern.permute.xlu1 (!%p216_p3), %v1040_v3  ;;  %944 = vset.pattern.permute.xlu0 (!%p216_p3), %v1040_v3  ;;  %s1042_s13 = smov (!%p216_p3), 127   ;;  %v1045_v34 = vmov (!%p216_p3), 0.0   ;;  %v401_v39 = vlaneseq (!%p216_p3)  ;;  %v1046_v48 = vmov (!%p216_p3), 2   ;;  %v1047_v49 = vmov (!%p216_p3), 3  }
   0xb   : > { %827 = vmatprep.subr.bf16.mxu0 (!%p216_p3), %v1041_v7  ;;  %824 = vmatprep.mubr.msk.f32.mxu0 (!%p216_p3), %vm1044_vm0, %v1045_v34 }
   0xc   : > { %v1147_v40 = vshrl.u32 (!%p216_p3), %v401_v39, 7  ;;  %v1149_v41 = vand.u32 (!%p216_p3), 127, %v401_v39 }
   0xe   : > { %v550_v42 = vcvt.s32.f32 (!%p216_p3), %v1147_v40  ;;  %v551_v43 = vcvt.s32.f32 (!%p216_p3), %v1149_v41  ;;  %v403_v60 = vsub.s32 (!%p216_p3), 0, %v1147_v40  ;;  %v413_v61 = vsub.s32 (!%p216_p3), 1, %v1147_v40 }
  0x10   : > { %s1248_s15 = smov (!%p264_p5, %s1001_s15), 1  ;;  %s1250_s16 = smov (!%p266_p6, %s1005_s16), 1  ;;  %v552_v44 = vmul.f32 128.0, %v550_v42 }
  0x11   : > { %s763_s22 = sshll.u32 %s1248_s15, 1  ;;  %s774_s9 = sshll.u32 %s1250_s16, 7 }
  0x12   : > { %s269_s23 = sadd.s32 %s763_s22, %s1250_s16  ;;  %s1127_s12 = scalar_lea.vmem %s1233_s3, %s774_s9  ;;  %v1157_v45 = vadd.f32 %v552_v44, %v551_v43 }
  0x13   : > { %s1106_s24 = sshll.u32 %s269_s23, 3  ;;  %v307_v4 = vld [vmem:[%s1127_s12] sm:$0xff]  ;;  %v308_v5 = vld [vmem:[%s1127_s12 + $0x8] sm:$0xff]  ;;  %v309_v6 = vld [vmem:[%s1127_s12 + $0x10] sm:$0xff]  ;;  %s767_s14 = sshll.u32 %s1250_s16, 3 }
  0x14   : > { %s271_s27 = scalar_lea.vmem %s1230_s0, %s1106_s24  ;;  %s279_s30 = scalar_lea.vmem %s1231_s1, %s1106_s24  ;;  %v828_v8 = vpack.c.bf16 %v308_v5, %v307_v4  ;;  %v310_v9 = vld [vmem:[%s1127_s12 + $0x18] sm:$0xff]  ;;  %v311_v11 = vld [vmem:[%s1127_s12 + $0x20] sm:$0xff]  ;;  %v312_v12 = vld [vmem:[%s1127_s12 + $0x28] sm:$0xff] }
  0x15   : > { %s296_s7 = scalar_lea.vmem %s1234_s4, %s1106_s24  ;;  %v297_v0 = vld [vmem:[%s271_s27] sm:$0xff]  ;;  %v831_v10 = vpack.c.bf16 %v310_v9, %v309_v6  ;;  %v834_v16 = vpack.c.bf16 %v312_v12, %v311_v11  ;;  %v313_v17 = vld [vmem:[%s1127_s12 + $0x30] sm:$0xff]  ;;  %v314_v18 = vld [vmem:[%s1127_s12 + $0x38] sm:$0xff]  ;;  %s283_s23 = scalar_lea.vmem %s1232_s2, %s767_s14 }
  0x16   : > { %v1120_v1 = vld [vmem:[%s279_s30] sm:$0xff]  ;;  %298 = vmax.xlane.f32.xlu0 %v297_v0  ;;  %829 = vmatpush3.bf16.msra.mxu0 %v828_v8  ;;  %v837_v20 = vpack.c.bf16 %v314_v18, %v313_v17  ;;  %v316_v22 = vld [vmem:[%s1127_s12 + $0x48] sm:$0xff]  ;;  %v317_v29 = vld [vmem:[%s1127_s12 + $0x50] sm:$0xff]  ;;  %s1182_s16 = smov 0  }
  0x17   : > { %v442_v2 = vmul.f32 0.5, %v1120_v1  ;;  %830 = vmatprep.subr.bf16.mxu0 %v1041_v7  ;;  %v315_v21 = vld [vmem:[%s1127_s12 + $0x40] sm:$0xff]  ;;  %v318_v30 = vld [vmem:[%s1127_s12 + $0x58] sm:$0xff]  ;;  %v320_v33 = vld [vmem:[%s1127_s12 + $0x68] sm:$0xff] }
  0x18   : > { %v840_v23 = vpack.c.bf16 %v316_v22, %v315_v21  ;;  %v843_v31 = vpack.c.bf16 %v318_v30, %v317_v29  ;;  %v319_v32 = vld [vmem:[%s1127_s12 + $0x60] sm:$0xff]  ;;  %v321_v36 = vld [vmem:[%s1127_s12 + $0x70] sm:$0xff]  ;;  %v322_v37 = vld [vmem:[%s1127_s12 + $0x78] sm:$0xff] }
  0x19   : > { %444 = vrot.lane.b32.xlu1 %v442_v2, %s1039_s8  ;;  %v846_v35 = vpack.c.bf16 %v320_v33, %v319_v32  ;;  %v849_v38 = vpack.c.bf16 %v322_v37, %v321_v36  ;;  %v1167_v53 = vld [vmem:[%s283_s23] sm:$0xff]  ;;  %v424_v32 = vsub.s32 2, %v1147_v40 }
  0x1a   : > { %832 = vmatpush3.bf16.msra.mxu0 %v831_v10  ;;  %v449_v54 = vmul.f32 0.5, %v1167_v53  ;;  %v404_v30 = vrot.slane %v1167_v53, %v403_v60 }
  0x1b   : > { %833 = vmatprep.subr.bf16.mxu0 %v1041_v7 }
  0x1c   : > { %v451_v56 = vrot.slane %v449_v54, 2 }
  0x1e   : > { %835 = vmatpush3.bf16.msra.mxu0 %v834_v16  ;;  %v453_v57 = vsub.f32 %v1167_v53, %v451_v56  ;;  %v454_v58 = vadd.f32 %v451_v56, %v1167_v53 }
  0x1f   : > { %836 = vmatprep.subr.bf16.mxu0 %v1041_v7 }
  0x20   : > { %v504_v62 = vsub.f32 %v454_v58, %v453_v57  ;;  %v473_v63 = vrot.slane %v453_v57, %v403_v60  ;;  %v463_v2 = vrot.slane %v454_v58, %v403_v60 }
  0x22   : > { %838 = vmatpush3.bf16.msra.mxu0 %v837_v20  ;;  %v506_v5 = vrot.slane %v504_v62, 1 }
  0x23   : > { %839 = vmatprep.subr.bf16.mxu0 %v1041_v7 }
  0x24   : > { %v508_v12 = vmul.f32 %v506_v5, %v504_v62 }
  0x26   : > { %841 = vmatpush3.bf16.msra.mxu0 %v840_v23  ;;  %v517_v20 = vrot.slane %v508_v12, %v403_v60  ;;  %v541_v60 = vsub.f32 1.0, %v1167_v53  ;;  %v1027_v12 = vmov 0.0  }
  0x27   : > { %842 = vmatprep.subr.bf16.mxu0 %v1041_v7 }
  0x2a   : > { %844 = vmatpush3.bf16.msra.mxu0 %v843_v31  ;;  %v414_v31 = vrot.slane %v1167_v53, %v413_v61 }
  0x2b   : > { %845 = vmatprep.subr.bf16.mxu0 %v1041_v7 }
  0x2e   : > { %847 = vmatpush3.bf16.msra.mxu0 %v846_v35  ;;  %v435_v35 = vsub.s32 3, %v1147_v40 }
  0x2f   : > { %848 = vmatprep.subr.bf16.mxu0 %v1041_v7 }
  0x32   : > { %850 = vmatpush3.bf16.msra.mxu0 %v849_v38  ;;  %v425_v38 = vrot.slane %v1167_v53, %v424_v32 }
  0x8b   : > { %v445_v13 = vpop.permute.xlu1 %444 }
  0x8c   : > { %v447_v14 = vsub.f32 %v1120_v1, %v445_v13  ;;  %v448_v15 = vadd.f32 %v445_v13, %v1120_v1 }
  0x8e   : > { %v498_v19 = vsub.f32 %v448_v15, %v447_v14 }
  0x90   : > { %500 = vrot.lane.b32.xlu1 %v498_v19, %s1042_s13 }
  0x94   : > { %467 = vperm.xlu1 %945, %v447_v14  }
  0x98   : > { %946 = vset.pattern.permute.xlu1 %v1043_v24 }
  0x99   : > { %478 = vperm.xlu1 %946, %v448_v15  }
  0x9d   : > { %487 = vperm.xlu1 %946, %v447_v14  }
  0xa1   : > { %947 = vset.pattern.permute.xlu1 %v1040_v3 }
  0xa3   : > { %v299_v25 = vpop.xlane.xlu0 %298 }
  0xa4   : > { %v300_v26 = vsub.f32 %v297_v0, %v299_v25  ;;  %v484_v0 = vrot.slane %v454_v58, %v413_v61 }
  0xa6   : > { %v301_v27 = vmul.f32 1.442695, %v300_v26 }
  0xa8   : > { %951 = vpow2.f32 %v301_v27 }
  0xb2   : > { %v952_v28 = vpop.eup %951 }
  0xb3   : > { %303 = vadd.xlane.f32.xlu0 %v952_v28 }
  0xc9   : > { %457 = vperm.xlu0 %944, %v448_v15  }
 0x102   : > { %v501_v46 = vpop.permute.xlu1 %500 }
 0x103   : > { %v503_v47 = vmul.f32 %v501_v46, %v498_v19 }
 0x105   : > { %511 = vperm.xlu1 %947, %v503_v47   ;;  %v436_v47 = vrot.slane %v1167_v53, %v435_v35 }
 0x109   : > { %398 = vperm.xlu1 %947, %v1120_v1  }
 0x10d   : > { %948 = vset.pattern.permute.xlu1 %v1043_v24 }
 0x10e   : > { %408 = vperm.xlu1 %948, %v1120_v1  }
 0x112   : > { %949 = vset.pattern.permute.xlu1 %v1046_v48 }
 0x113   : > { %419 = vperm.xlu1 %949, %v1120_v1   ;;  %v468_v55 = vpop.permute.xlu1 %467 }
 0x114   : > { %v474_v6 = vmax.f32 %v468_v55, %v473_v63  ;;  %v524_v14 = vmin.f32 %v468_v55, %v473_v63  ;;  %v542_v63 = vmul.f32 1e+09, %v541_v60 }
 0x117   : > { %950 = vset.pattern.permute.xlu1 %v1047_v49 }
 0x118   : > { %430 = vperm.xlu1 %950, %v1120_v1   ;;  %v479_v59 = vpop.permute.xlu1 %478  ;;  %v493_v1 = vrot.slane %v453_v57, %v413_v61 }
 0x119   : > { %v485_v7 = vmin.f32 %v479_v59, %v484_v0  ;;  %v526_v15 = vmax.f32 %v479_v59, %v484_v0  ;;  %v545_v0 = vsub.s32 4, %v1147_v40 }
 0x11c   : > { %v488_v3 = vpop.permute.xlu1 %487 }
 0x11d   : > { %v494_v8 = vmax.f32 %v488_v3, %v493_v1  ;;  %v527_v16 = vmin.f32 %v488_v3, %v493_v1 }
 0x11f   : > { %v495_v10 = vsub.f32 %v485_v7, %v494_v8  ;;  %v528_v22 = vsub.f32 %v526_v15, %v527_v16  ;;  %v546_v7 = vrot.slane %v542_v63, %v545_v0 }
 0x121   : > { %v496_v18 = vmax.f32 %v495_v10, 0.0  ;;  %v1019_v10 = vmov 0.0  }
 0x140   : > { %v304_v50 = vpop.xlane.xlu0 %303 }
 0x141   : > { %953 = vrcp.f32 %v304_v50 }
 0x148   : > { %v458_v4 = vpop.permute.xlu0 %457 }
 0x149   : > { %v464_v9 = vmin.f32 %v458_v4, %v463_v2  ;;  %v523_v17 = vmax.f32 %v458_v4, %v463_v2 }
 0x14b   : > { %v954_v51 = vpop.eup %953  ;;  %v475_v11 = vsub.f32 %v464_v9, %v474_v6  ;;  %v525_v23 = vsub.f32 %v523_v17, %v524_v14 }
 0x14c   : > { %v306_v52 = vmul.f32 %v954_v51, %v952_v28 }
 0x14d   : > { %v476_v19 = vmax.f32 %v475_v11, 0.0  ;;  %v529_v26 = vmul.f32 %v528_v22, %v525_v23  ;;  %v1023_v11 = vmov 0.0  }
 0x14e   : > { %825 = vmatmul.mubr.f32.vlgmr.msra.gmra.mrb[0].mxu0 %v306_v52 }
 0x14f   : > { %v497_v24 = vmul.f32 %v496_v18, %v476_v19  ;;  %v531_v29 = vadd.f32 1e-07, %v529_v26 }
 0x151   : > { %955 = vrcp.f32 %v531_v29 }
 0x15b   : > { %v956_v52 = vpop.eup %955 }
 0x184   : > { %v512_v13 = vpop.permute.xlu1 %511 }
 0x185   : > { %v518_v25 = vadd.f32 %v517_v20, %v512_v13 }
 0x187   : > { %v519_v27 = vsub.f32 %v518_v25, %v497_v24 }
 0x188   : > { %v399_v21 = vpop.permute.xlu1 %398 }
 0x189   : > { %v520_v33 = vadd.f32 1e-07, %v519_v27  ;;  %v405_v36 = vsub.f32 %v399_v21, %v404_v30  ;;  %v530_v54 = vsub.f32 %v529_v26, %v519_v27 }
 0x18b   : > { %957 = vrcp.f32 %v520_v33  ;;  %v406_v39 = vand.u32 2147483647, %v405_v36  ;;  %v533_v59 = vmul.f32 %v956_v52, %v530_v54 }
 0x18d   : > { %v409_v28 = vpop.permute.xlu1 %408 }
 0x18e   : > { %v415_v37 = vsub.f32 %v409_v28, %v414_v31 }
 0x190   : > { %v416_v44 = vand.u32 2147483647, %v415_v37 }
 0x192   : > { %v420_v34 = vpop.permute.xlu1 %419  ;;  %v417_v49 = vadd.f32 %v416_v44, %v406_v39 }
 0x193   : > { %v426_v46 = vsub.f32 %v420_v34, %v425_v38 }
 0x195   : > { %v427_v50 = vand.u32 2147483647, %v426_v46  ;;  %v958_v55 = vpop.eup %957 }
 0x196   : > { %v522_v58 = vmul.f32 %v958_v55, %v497_v24 }
 0x197   : > { %v431_v48 = vpop.permute.xlu1 %430  ;;  %v428_v56 = vadd.f32 %v427_v50, %v417_v49 }
 0x198   : > { %v437_v51 = vsub.f32 %v431_v48, %v436_v47  ;;  %v534_v62 = vsub.f32 %v522_v58, %v533_v59 }
 0x19a   : > { %v438_v57 = vand.u32 2147483647, %v437_v51  ;;  %v535_v6 = vmul.f32 2.0, %v534_v62 }
 0x19c   : > { %v439_v61 = vadd.f32 %v438_v57, %v428_v56 }
 0x19e   : > { %v440_v2 = vmul.f32 5.0, %v439_v61 }
 0x221   : > { %v389_v1 = vpop.f32.mrb[0].mxu0 }
 0x222   : > { %v393_v3 = vmul.f32 -1.0, %v389_v1  ;;  %v826_v4 = vpop.f32.mrb[1].mxu0 }
 0x224   : > { %v441_v5 = vadd.f32 %v440_v2, %v393_v3 }
 0x226   : > { %v536_v8 = vsub.f32 %v441_v5, %v535_v6 }
 0x228   : > { %v547_v9 = vadd.f32 %v546_v7, %v536_v8  }
 0x22a   : > { %v1031_v13 = vmov %v547_v9  }
 0x22b LB: >> { %564 = vmin.xlane.f32.xlu0 %v1033_v13  ;;  %v596_v20 = vstv %s1037_s16  ;;  %s559_s16 = sadd.s32 1, %s1037_s16   ;;  %s1037_s16 = sphi %s1182_s16, %s559_s16   ;;  %v1033_v13 = vphi %v1031_v13, %v595_v13   ;;  %v1029_v12 = vphi %v1027_v12, %v1028_v12   ;;  %v1025_v11 = vphi %v1023_v11, %v1024_v11   ;;  %v1021_v10 = vphi %v1019_v10, %v1020_v10  }
 0x22c   : >> { %vm597_vm1 = vcmp.eq.s32.totalorder %v1149_v41, %v596_v20  ;;  %p556_p7 = scmp.ge.s32.totalorder %s559_s16, 4  }
 0x22d   : > { %vm604_vm8 = vcmp.eq.s32.totalorder (%p556_p7), %v1147_v40, 0  ;;  %vm606_vm9 = vcmp.eq.s32.totalorder (%p556_p7), %v1147_v40, 1  ;;  %vm609_vm10 = vcmp.eq.s32.totalorder (%p556_p7), %v1147_v40, 2 }
 0x2b8   : >> { %v565_v53 = vpop.xlane.xlu0 %564 }
 0x2b9   : >> { %v566_v14 = vrot.slane %v565_v53, 4 }
 0x2bb   : >> { %v567_v15 = vmin.f32 %v565_v53, %v566_v14 }
 0x2bd   : >> { %v568_v16 = vrot.slane %v567_v15, 2 }
 0x2bf   : >> { %v569_v17 = vmin.f32 %v567_v15, %v568_v16 }
 0x2c1   : >> { %v570_v18 = vrot.slane %v569_v17, 1 }
 0x2c3   : >> { %v571_v19 = vmin.f32 %v569_v17, %v570_v18 }
 0x2c5   : >> { %851 = vpush %v571_v19 }
 0x2f6   : >> { %s852_s25 = spop %851 }
 0x2f7   : >> { %v573_v21 = vstv %s852_s25 }
 0x2f8   : >> { %vm591_vm2 = vcmp.lt.f32.partialorder %v573_v21, 5e+08  ;;  %vm574_vm3 = vcmp.le.f32.partialorder %v1033_v13, %v573_v21 }
 0x2f9   : >> { %vm1189_vm4 = vmand %vm597_vm1, %vm591_vm2  ;;  %v575_v23 = vsel %vm574_vm3, %v1157_v45, 1024.0 }
 0x2fa   : >> { %v603_v24 = vsel %vm1189_vm4, 1.0, %v1021_v10   ;;  %576 = vmin.xlane.f32.xlu0 %v575_v23 }
 0x2fb   : >> { %v1020_v10 = vmov %v603_v24   ;;  %v610_v46 = vsel (%p556_p7), %vm609_vm10, %v603_v24, 0.0 }
 0x387   : >> { %v577_v25 = vpop.xlane.xlu0 %576 }
 0x388   : >> { %v578_v26 = vrot.slane %v577_v25, 4 }
 0x38a   : >> { %v579_v27 = vmin.f32 %v577_v25, %v578_v26 }
 0x38c   : >> { %v580_v28 = vrot.slane %v579_v27, 2 }
 0x38e   : >> { %v581_v29 = vmin.f32 %v579_v27, %v580_v28 }
 0x390   : >> { %v582_v30 = vrot.slane %v581_v29, 1 }
 0x392   : >> { %v583_v31 = vmin.f32 %v581_v29, %v582_v30 }
 0x394   : >> { %853 = vpush %v583_v31 }
 0x3c5   : >> { %s854_s26 = spop %853 }
 0x3c6   : >> { %v585_v32 = vstv %s854_s26 }
 0x3c7   : >> { %v587_v33 = vmul.f32 0.0078125, %v585_v32 }
 0x3c9   : >> { %v588_v34 = vfloor.f32 %v587_v33 }
 0x3cb   : >> { %v589_v35 = vmul.f32 128.0, %v588_v34  ;;  %v601_v36 = vsel %vm1189_vm4, %v588_v34, %v1029_v12   ;;  %vm592_vm5 = vcmp.eq.f32.partialorder %v550_v42, %v588_v34  ;;  %558 = sbr.rel (!%p556_p7) target bundleno = 555 (0x22b), region = 82 }
 0x3cc   : >> { %v1028_v12 = vmov %v601_v36   ;;  %v605_v39 = vsel (%p556_p7), %vm604_vm8, %v601_v36, 0.0 }
 0x3cd   : >> { %v590_v37 = vsub.f32 %v585_v32, %v589_v35 }
 0x3cf   : >> { %vm593_vm6 = vcmp.eq.f32.partialorder %v551_v43, %v590_v37  ;;  %v602_v38 = vsel %vm1189_vm4, %v590_v37, %v1025_v11  }
 0x3d0   : >> { %vm594_vm7 = vmor %vm592_vm5, %vm593_vm6  ;;  %v1024_v11 = vmov %v602_v38   ;;  %v607_v44 = vsel (%p556_p7), %vm606_vm9, %v602_v38, 0.0 }
 0x3d1   : >> { %v595_v13 = vsel %vm594_vm7, 1e+09, %v1033_v13   ;;  %v608_v47 = vadd.f32 (%p556_p7), %v607_v44, %v605_v39 }
 0x3d3   : > { %v611_v48 = vadd.f32 %v610_v46, %v608_v47 }
 0x3d5   : > { %612 = vst [vmem:[%s296_s7] sm:$0xff] %v611_v48 }
 0x3d6 PF: > { %s14_s19 = sadd.s32 1, %s1017_s19   ;;  %s1237_s15 = smov %s1009_s17 }
 0x3d7   : > { %p11_p8 = scmp.ge.s32.totalorder %s14_s19, 6   ;;  %s1238_s16 = smov %s1013_s18 }
 0x3d8   : > { %s1239_s17 = smov %s1242_s20  ;;  %s1240_s18 = smov %s1246_s21 }
 0x3d9   :  { %13 = sbr.rel (!%p11_p8) target bundleno = 3 (0x3), region = 93 }

// kernel: _detr_loss_impl.3
= control target key start
LH: loop header
LB: loop body
LE: loop exit
PB: predicated region body
PF: predicated region fallthrough
CT: control target
= control target key end

     0   :  { %s683_s15 = smov 0   ;;  %s685_s16 = smov 0   ;;  %s783_s0 = inlined_call_operand.vmem [shape: f32[2,16,128], index: 0, kind: input, shape index: {}]   ;;  %s784_s1 = inlined_call_operand.vmem [shape: s32[2,16,1], index: 1, kind: input, shape index: {}]   ;;  %s785_s2 = inlined_call_operand.vmem [shape: f32[1,128], index: 2, kind: input, shape index: {}]   ;;  %s786_s3 = inlined_call_operand.vmem [shape: f32[2,16,128], index: 3, kind: input, shape index: {}]   ;;  %s787_s4 = inlined_call_operand.vmem [shape: f32[2,1,128], index: 4, kind: output, shape index: {}]  }
   0x1   :  { %s687_s17 = smov 0   ;;  %s689_s18 = smov 0  }
   0x2   :  { %s691_s19 = smov 0  }
   0x3 LB: > { %s23_s20 = sadd.s32 1, %s642_s17  ;;  %s26_s21 = sadd.s32 1, %s646_s18  ;;  %s650_s19 = sphi %s691_s19, %s14_s19   ;;  %s646_s18 = sphi %s689_s18, %s791_s18   ;;  %s642_s17 = sphi %s687_s17, %s790_s17   ;;  %s638_s16 = sphi %s685_s16, %s789_s16   ;;  %s634_s15 = sphi %s683_s15, %s788_s15  }
   0x4   : > { %p24_p0 = scmp.ge.s32.totalorder %s23_s20, 2  ;;  %p535_p1 = scmp.ge.s32.totalorder %s650_s19, 1 }
   0x5   : > { %p204_p2 = scmp.lt.s32.totalorder %s650_s19, 5 }
   0x6   : > { %s793_s20 = smov (%p24_p0, %s23_s20), 0  ;;  %s795_s21 = smov (!%p24_p0, %s26_s21), %s646_s18 }
   0x7   : > { %p205_p3 = pnand %p535_p1, %p204_p2  ;;  %p28_p4 = scmp.ge.s32.totalorder %s795_s21, 2 }
   0x8   : > { %p244_p5 = scmp.lt.s32.totalorder (!%p205_p3), %s638_s16, 1  ;;  %p246_p6 = scmp.lt.s32.totalorder (!%p205_p3), %s634_s15, 1  ;;  %v268_v0 = vlaneseq (!%p205_p3) }
   0x9   : > { %s797_s21 = smov (%p28_p4, %s795_s21), 0  ;;  %208 = sbr.rel (%p205_p3) target bundleno = 635 (0x27b), region = 36 }
   0xa   : > { %v719_v1 = vand.u32 (!%p205_p3), 127, %v268_v0  ;;  %p542_p7 = scmp.ne.s32.totalorder (!%p205_p3), %s634_s15, 0 }
  0x10   : > { %s799_s16 = smov (!%p244_p5, %s638_s16), 1  ;;  %273 = sbr.rel (%p542_p7) target bundleno = 23 (0x17), region = 40 }
  0x11   : > { %s247_s22 = scalar_select %p246_p6, %s634_s15, 1 }
  0x12   : > { %s536_s23 = sshll.u32 %s799_s16, 1  ;;  %s550_s24 = sshll.u32 %s799_s16, 4  ;;  %v652_v2 = vmov (!%p542_p7), 0.0  }
  0x13   : > { %s249_s25 = sadd.s32 %s536_s23, %s247_s22  ;;  %s727_s28 = scalar_lea.vmem %s786_s3, %s550_s24  ;;  %274 = vst [vmem:[#allocation2] sm:$0x1] (!%p542_p7), %v652_v2 }
  0x14   : > { %s537_s29 = sshll.u32 %s249_s25, 3  ;;  %s267_s6 = scalar_lea.vmem %s787_s4, %s799_s16 }
  0x15   : > { %s251_s9 = scalar_lea.vmem %s783_s0, %s537_s29  ;;  %s259_s12 = scalar_lea.vmem %s784_s1, %s537_s29 }
  0x17 PF: > { %v275_v3 = vld [vmem:[%s251_s9] sm:$0xff]  ;;  %v653_v4 = vmov 0   ;;  %vm319_vm1 = vcmp.eq.s32.totalorder %v719_v1, 0  ;;  %vm324_vm2 = vcmp.eq.s32.totalorder %v719_v1, 1  ;;  %v654_v32 = vmov 0.0   ;;  %p546_p8 = scmp.ne.s32.totalorder %s634_s15, 1 }
  0x18   : > { %281 = vmax.xlane.f32.xlu0 %v275_v3  ;;  %v276_v5 = vld [vmem:[%s259_s12] sm:$0xff]  ;;  %v746_v33 = vsel %vm319_vm1, 1.0, %v654_v32  ;;  %v748_v37 = vsel %vm324_vm2, 1.0, %v654_v32  ;;  %v655_v46 = vmov (!%p546_p8), 0   ;;  %s656_s22 = smov (!%p546_p8), 127   ;;  %vm350_vm3 = vcmask (!%p546_p8), 1040384  }
  0x19   : > { %597 = vset.pattern.permute.xlu0 %v653_v4  ;;  %v543_v12 = vld [vmem:[%s785_s2] ss:$0 sm:$0xff]  ;;  %602 = vset.pattern.permute.xlu1 (!%p546_p8), %v655_v46  ;;  %vm431_vm4 = vcmp.eq.s32.totalorder (!%p546_p8), %v719_v1, 2 }
  0x1a   : > { %v318_v36 = vld [vmem:[#allocation2] sm:$0x1] }
  0x1b   : > { %v342_v43 = vld [vmem:[%s727_s28] sm:$0xff] (!%p546_p8) }
  0x1c   : > { %v344_v45 = vmul.f32 (!%p546_p8), 0.5, %v342_v43 }
  0x1e   : > { %v346_v47 = vrot.slane (!%p546_p8), %v344_v45, 2 }
  0x20   : > { %v348_v48 = vsub.f32 (!%p546_p8), %v342_v43, %v346_v47  ;;  %v349_v49 = vadd.f32 (!%p546_p8), %v346_v47, %v342_v43 }
  0x22   : > { %v356_v50 = vrot.slane (!%p546_p8), %v348_v48, 4  ;;  %v365_v51 = vrot.slane (!%p546_p8), %v349_v49, 4  ;;  %v388_v52 = vsub.f32 (!%p546_p8), %v349_v49, %v348_v48 }
  0x24   : > { %v358_v53 = vsub.f32 (!%p546_p8), %v348_v48, %v356_v50  ;;  %v367_v54 = vsub.f32 (!%p546_p8), %v349_v49, %v365_v51  ;;  %v380_v55 = vmin.f32 (!%p546_p8), %v349_v49, %v365_v51  ;;  %v381_v56 = vmax.f32 (!%p546_p8), %v348_v48, %v356_v50 }
  0x25   : > { %v390_v57 = vrot.slane (!%p546_p8), %v388_v52, 1  ;;  %v401_v58 = vmax.f32 (!%p546_p8), %v349_v49, %v365_v51  ;;  %v402_v59 = vmin.f32 (!%p546_p8), %v348_v48, %v356_v50  ;;  %v657_v48 = vmov (!%p546_p8), 0.0  }
  0x26   : > { %v359_v60 = vand.u32 (!%p546_p8), 2147483647, %v358_v53  ;;  %v368_v61 = vand.u32 (!%p546_p8), 2147483647, %v367_v54  ;;  %v382_v62 = vsub.f32 (!%p546_p8), %v380_v55, %v381_v56  ;;  %v547_v49 = vsel (!%p546_p8), %vm431_vm4, 1.0, %v657_v48 }
  0x27   : > { %v392_v63 = vmul.f32 (!%p546_p8), %v390_v57, %v388_v52  ;;  %v403_v2 = vsub.f32 (!%p546_p8), %v401_v58, %v402_v59 }
  0x28   : > { %v383_v4 = vmax.f32 (!%p546_p8), %v382_v62, 0.0 }
  0x2e   : > { %278 = vperm.xlu0 %597, %v276_v5   ;;  %v394_v5 = vrot.slane (!%p546_p8), %v392_v63, 4 }
  0x32   : > { %603 = vset.pattern.permute.xlu0 (!%p546_p8), %v655_v46 }
  0xa5   : > { %v282_v6 = vpop.xlane.xlu0 %281 }
  0xa6   : > { %v283_v7 = vsub.f32 %v275_v3, %v282_v6 }
  0xa8   : > { %v284_v8 = vmul.f32 1.442695, %v283_v7 }
  0xaa   : > { %598 = vpow2.f32 %v284_v8  ;;  %v371_v8 = vrot.slane (!%p546_p8), %v368_v61, 1 }
  0xad   : > { %v279_v9 = vpop.permute.xlu0 %278 }
  0xae   : > { %vm280_vm0 = vcmp.eq.s32.totalorder %v719_v1, %v279_v9  ;;  %v385_v9 = vrot.slane (!%p546_p8), %v383_v4, 1 }
  0xaf   : > { %v291_v11 = vsel %vm280_vm0, %v275_v3, 0.0  ;;  %v301_v13 = vsel %vm280_vm0, %v543_v12, 0.0  ;;  %v361_v3 = vrot.slane (!%p546_p8), %v359_v60, 1 }
  0xb1   : > { %v363_v7 = vadd.f32 (!%p546_p8), %v361_v3, %v359_v60 }
  0xb3   : > { %v369_v12 = vadd.f32 (!%p546_p8), %v368_v61, %v363_v7 }
  0xb4   : > { %v599_v10 = vpop.eup %598 }
  0xb5   : > { %286 = vadd.xlane.f32.xlu1 %v599_v10  ;;  %v396_v10 = vadd.f32 (!%p546_p8), %v394_v5, %v392_v63 }
  0xb9   : > { %292 = vadd.xlane.f32.xlu1 %v291_v11 }
  0xbd   : > { %302 = vadd.xlane.f32.xlu1 %v301_v13  ;;  %v387_v13 = vmul.f32 (!%p546_p8), %v385_v9, %v383_v4 }
 0x142   : > { %v287_v14 = vpop.xlane.xlu1 %286 }
 0x143   : > { %600 = vlog2.f32 %v287_v14 }
 0x146   : > { %v293_v15 = vpop.xlane.xlu1 %292 }
 0x14a   : > { %v303_v16 = vpop.xlane.xlu1 %302 }
 0x14b   : > { %v312_v17 = vrot.slane %v303_v16, 4 }
 0x14d   : > { %v601_v18 = vpop.eup %600  ;;  %v313_v21 = vadd.f32 %v312_v17, %v303_v16  ;;  %v343_v17 = vld [vmem:[%s727_s28 + $0x8] sm:$0xff] (!%p546_p8) }
 0x14e   : > { %v289_v19 = vmul.f32 0.6931472, %v601_v18 }
 0x14f   : > { %v314_v24 = vrot.slane %v313_v21, 2 }
 0x150   : > { %v290_v20 = vadd.f32 %v289_v19, %v282_v6  ;;  %v405_v6 = vrot.slane (!%p546_p8), %v403_v2, 1 }
 0x151   : > { %v315_v27 = vadd.f32 %v314_v24, %v313_v21 }
 0x152   : > { %v304_v22 = vsub.f32 %v290_v20, %v293_v15  ;;  %v407_v11 = vmul.f32 (!%p546_p8), %v405_v6, %v403_v2  ;;  %v373_v15 = vadd.f32 (!%p546_p8), %v371_v8, %v369_v12 }
 0x153   : > { %v316_v30 = vrot.slane %v315_v27, 1 }
 0x154   : > { %v305_v23 = vmul.f32 %v304_v22, %v303_v16  ;;  %v409_v14 = vadd.f32 (!%p546_p8), 1e-07, %v407_v11  ;;  %v397_v16 = vsub.f32 (!%p546_p8), %v396_v10, %v387_v13  ;;  %v374_v18 = vmul.f32 (!%p546_p8), %v373_v15, %v343_v17 }
 0x155   : > { %v317_v35 = vadd.f32 %v316_v30, %v315_v27 }
 0x156   : > { %v306_v25 = vrot.slane %v305_v23, 4  ;;  %604 = vrcp.f32 (!%p546_p8), %v409_v14  ;;  %v398_v19 = vadd.f32 (!%p546_p8), 1e-07, %v397_v16  ;;  %v375_v20 = vsel (!%p546_p8), %vm350_vm3, %v374_v18, 0.0 }
 0x157   : > { %v327_v40 = vmul.f32 %v748_v37, %v317_v35  ;;  %376 = vadd.xlane.f32.xlu1 (!%p546_p8), %v375_v20  ;;  %v408_v21 = vsub.f32 (!%p546_p8), %v407_v11, %v397_v16 }
 0x158   : > { %v307_v26 = vadd.f32 %v306_v25, %v305_v23  ;;  %606 = vrcp.f32 (!%p546_p8), %v398_v19  ;;  %v351_v23 = vsel (!%p546_p8), %vm350_vm3, %v343_v17, 0.0 }
 0x15a   : > { %v308_v28 = vrot.slane %v307_v26, 2 }
 0x15c   : > { %v309_v29 = vadd.f32 %v308_v28, %v307_v26 }
 0x15e   : > { %v310_v31 = vrot.slane %v309_v29, 1 }
 0x160   : > { %v311_v34 = vadd.f32 %v310_v31, %v309_v29  ;;  %v605_v22 = vpop.eup (!%p546_p8), %604 }
 0x161   : > { %v411_v24 = vmul.f32 (!%p546_p8), %v605_v22, %v408_v21 }
 0x162   : > { %v322_v38 = vmul.f32 %v746_v33, %v311_v34  ;;  %333 = sbr.rel (%p546_p8) target bundleno = 635 (0x27b), region = 44  ;;  %v607_v25 = vpop.eup (!%p546_p8), %606 }
 0x163   : > { %v400_v26 = vmul.f32 (!%p546_p8), %v607_v25, %v387_v13 }
 0x164   : > { %v323_v39 = vadd.f32 %v322_v38, %v318_v36 }
 0x165   : > { %v412_v27 = vsub.f32 (!%p546_p8), %v400_v26, %v411_v24 }
 0x166   : > { %v328_v41 = vadd.f32 %v327_v40, %v323_v39  ;;  %v425_v39 = vshrl.u32 (!%p546_p8), %v268_v0, 7 }
 0x167   : > { %v413_v28 = vsub.f32 (!%p546_p8), 1.0, %v412_v27 }
 0x168   : > { %329 = vst [vmem:[#allocation2] sm:$0x1] %v328_v41  ;;  %v426_v43 = vsub.s32 (!%p546_p8), 0, %v425_v39 }
 0x169   : > { %v414_v29 = vmul.f32 %v413_v28, %v343_v17 }
 0x16b   : > { %v415_v30 = vsel %vm350_vm3, %v414_v29, 0.0 }
 0x16c   : > { %416 = vadd.xlane.f32.xlu1 %v415_v30 }
 0x16f   : > { %v753_v42 = vld [vmem:[#allocation2] sm:$0x1] }
 0x170   : > { %v335_v44 = vmax.f32 %v753_v42, 1e-12 }
 0x172   : > { %337 = vrot.lane.b32.xlu0 %v335_v44, %s656_s22 }
 0x191   : > { %352 = vadd.xlane.f32.xlu0 %v351_v23 }
 0x1e4   : > { %v338_v31 = vpop.permute.xlu0 %337  ;;  %v377_v38 = vpop.xlane.xlu1 %376 }
 0x1e5   : > { %608 = vrcp.f32 %v338_v31 }
 0x1ef   : > { %v609_v32 = vpop.eup %608 }
 0x1f0   : > { %v341_v34 = vmul.f32 %v609_v32, %v753_v42 }
 0x1f2   : > { %421 = vperm.xlu1 %602, %v341_v34  }
 0x1f9   : > { %v417_v40 = vpop.xlane.xlu1 %416 }
 0x21e   : > { %v353_v35 = vpop.xlane.xlu0 %352 }
 0x21f   : > { %v354_v36 = vmax.f32 %v353_v35, 1.0 }
 0x221   : > { %610 = vrcp.f32 %v354_v36 }
 0x22b   : > { %v611_v41 = vpop.eup %610 }
 0x22c   : > { %v379_v44 = vmul.f32 %v611_v41, %v377_v38  ;;  %v418_v46 = vmul.f32 %v611_v41, %v417_v40 }
 0x22e   : > { %v429_v42 = vmul.f32 %v748_v37, %v379_v44  ;;  %v434_v51 = vmul.f32 %v547_v49, %v418_v46 }
 0x271   : > { %v422_v45 = vpop.permute.xlu1 %421 }
 0x272   : > { %v427_v47 = vrot.slane %v422_v45, %v426_v43 }
 0x274   : > { %v428_v50 = vmul.f32 %v746_v33, %v427_v47 }
 0x276   : > { %v430_v52 = vadd.f32 %v429_v42, %v428_v50 }
 0x278   : > { %v435_v53 = vadd.f32 %v434_v51, %v430_v52 }
 0x27a   : > { %436 = vst [vmem:[%s267_s6] sm:$0x1] %v435_v53 }
 0x27b PF: > { %s14_s19 = sadd.s32 1, %s650_s19   ;;  %s788_s15 = smov %s642_s17 }
 0x27c   : > { %p11_p9 = scmp.ge.s32.totalorder %s14_s19, 6   ;;  %s789_s16 = smov %s646_s18 }
 0x27d   : > { %s790_s17 = smov %s793_s20  ;;  %s791_s18 = smov %s797_s21 }
 0x27e   :  { %13 = sbr.rel (!%p11_p9) target bundleno = 3 (0x3), region = 80 }

</bundles_post_ra>
